<compile_context>
chip_gen: v7x
topology: tpu7x:2x2x1
jax: 0.10.0
libtpu: 0.0.40
codegen_flags: <defaults>
</compile_context>

<pallas_src>
import jax
import jax.numpy as jnp
from jax import lax
from jax.experimental import pallas as pl
from jax.experimental.pallas import tpu as pltpu

NUM_CH = 7
FLOOR = -20.0
# Self-cancelling pad sentinel: bf16-exact, (PAD > FLOOR) is False,
# exp(-|PAD|) == 0 and softplus(-PAD) + PAD == 0 exactly.
PAD_VAL = -16384.0
WEIGHTS = jnp.array([2049.16, 2049.16, 0.0079, 2.257, 23.96, 23.96, 23.522],
                    dtype=jnp.float32)
DEFAULT_GROUP = 16        # original rows packed per super-row (lane density)
DEFAULT_TILE_SR = 2048    # super-rows per grid step (= 32768 original rows)
VMEM_LIMIT_BYTES = 32 * 1024 * 1024


def _round_up(x, m):
    return ((x + m - 1) // m) * m


def _make_kernel(num_super_rows, tile_sr, ragged):
    """Kernel accumulating per-packed-lane partial sums into a (5, 7G) block."""

    def kernel(yp_ref, yt_ref, se_ref, so_ref, acc_ref):
        step = pl.program_id(0)

        @pl.when(step == 0)
        def _init():
            acc_ref[...] = jnp.zeros_like(acc_ref)

        yp = yp_ref[...].astype(jnp.float32)   # (tile_sr, 14G) packed interleaved
        yt = yt_ref[...].astype(jnp.float32)   # (tile_sr, 7G) packed targets

        if ragged:
            # Only the final (partial) block needs this; out-of-bounds sublanes
            # hold undefined data, so force them to the self-cancelling pad.
            row = step * tile_sr + lax.broadcasted_iota(jnp.int32, (tile_sr, 1), 0)
            ok = row < num_super_rows
            yp = jnp.where(ok, yp, PAD_VAL)
            yt = jnp.where(ok, yt, PAD_VAL)

        # Exact even/odd lane de-interleave on the MXU: packed logit / regression
        # lanes land aligned with the packed-ytrue lanes.  HIGHEST precision keeps
        # the 0/1-selection numerically exact (no bf16 quantization of the data).
        x0 = jnp.dot(yp, se_ref[...], preferred_element_type=jnp.float32,
                     precision=jax.lax.Precision.HIGHEST)          # logits (tile, 7G)
        x1 = jnp.dot(yp, so_ref[...], preferred_element_type=jnp.float32,
                     precision=jax.lax.Precision.HIGHEST)          # regression (tile, 7G)

        y = (yt > FLOOR).astype(jnp.float32)                       # positives
        # softplus(-x0) computed once; softplus(x0) = softplus(-x0) + x0.
        sn = jnp.maximum(-x0, 0.0) + jnp.log1p(jnp.exp(-jnp.abs(x0)))
        diff = x1 - yt
        sq = diff * diff

        bce_pos = jnp.sum(y * sn, axis=0, keepdims=True)                  # (1, 7G)
        bce_neg = jnp.sum((1.0 - y) * (sn + x0), axis=0, keepdims=True)   # (1, 7G)
        n_pos = jnp.sum(y, axis=0, keepdims=True)                         # (1, 7G)
        sum_pos = jnp.sum(sq * y, axis=0, keepdims=True)                  # (1, 7G)
        sum_sq = jnp.sum(sq, axis=0, keepdims=True)                       # (1, 7G)

        # Single fused accumulator update (one add + one store per step).
        acc_ref[...] += jnp.concatenate(
            [bce_pos, bce_neg, n_pos, sum_pos, sum_sq], axis=0)

    return kernel


def combined_loss(ypred, ytrue, *, group=DEFAULT_GROUP, tile_sr=DEFAULT_TILE_SR):
    """ypred: (N, 14), ytrue: (N, 7) -> scalar loss (matches the PyTorch module)."""
    n = ypred.shape[0]
    assert ypred.shape == (n, 2 * NUM_CH), ypred.shape
    assert ytrue.shape == (n, NUM_CH), ytrue.shape

    g = max(1, int(group))
    n_pad = _round_up(n, g)
    if n_pad != n:
        # Pad with the self-cancelling sentinel: padded rows add exactly 0 to
        # every accumulated sum, so no element-level masking is needed.
        pad = ((0, n_pad - n), (0, 0))
        ypred = jnp.pad(ypred, pad, constant_values=PAD_VAL)
        ytrue = jnp.pad(ytrue, pad, constant_values=PAD_VAL)

    r = n_pad // g                      # number of super-rows
    cw = NUM_CH * g                     # packed-ytrue lane width (7G)
    yp2 = ypred.reshape(r, 2 * cw)      # zero-copy, lane-dense (14G lanes)
    yt2 = ytrue.reshape(r, cw)          # zero-copy, lane-dense (7G lanes)

    tile = max(8, min(int(tile_sr), _round_up(r, 8)))
    tile = _round_up(tile, 8)           # sublane aligned
    nblk = pl.cdiv(r, tile)
    ragged = (r % tile) != 0

    # Constant 0/1 even/odd lane selectors (resident VMEM inputs, built once).
    rows = jnp.arange(2 * cw, dtype=jnp.int32)[:, None]
    cols = jnp.arange(cw, dtype=jnp.int32)[None, :]
    sel_even = (rows == 2 * cols).astype(jnp.float32)        # (14G, 7G)
    sel_odd = (rows == 2 * cols + 1).astype(jnp.float32)     # (14G, 7G)

    kernel = _make_kernel(r, tile, ragged)

    partials = pl.pallas_call(
        kernel,
        out_shape=jax.ShapeDtypeStruct((5, cw), jnp.float32),
        grid=(nblk,),
        in_specs=[
            pl.BlockSpec((tile, 2 * cw), lambda i: (i, 0)),
            pl.BlockSpec((tile, cw), lambda i: (i, 0)),
            pl.BlockSpec((2 * cw, cw), lambda i: (0, 0)),   # resident constant
            pl.BlockSpec((2 * cw, cw), lambda i: (0, 0)),   # resident constant
        ],
        out_specs=pl.BlockSpec((5, cw), lambda i: (0, 0)),
        compiler_params=pltpu.CompilerParams(
            dimension_semantics=("arbitrary",),
            vmem_limit_bytes=VMEM_LIMIT_BYTES),
    )(yp2, yt2, sel_even, sel_odd)

    # Tiny finalize: fold the G packed sub-rows back to 7 channels, then apply
    # the flagged-subset means (not decomposable per block, so done globally).
    sums = jnp.sum(partials.reshape(5, g, NUM_CH), axis=1)    # (5, 7)
    bce_pos, bce_neg, n_pos, sum_pos, sum_sq = sums
    n_f = jnp.float32(n)

    class_err = (WEIGHTS * bce_pos + bce_neg) / n_f
    has_pos = n_pos > 0.0
    has_neg = n_pos < n_f
    reg_pos = jnp.where(has_pos, WEIGHTS * sum_pos / jnp.maximum(n_pos, 1.0), 0.0)
    reg_neg = jnp.where(has_pos & has_neg,
                        (sum_sq - sum_pos) / jnp.maximum(n_f - n_pos, 1.0), 0.0)
    return jnp.sum(class_err + reg_pos + reg_neg)


def _reference_loss(ypred, ytrue):
    """Pure-JAX mirror of the PyTorch forward (sanity check)."""
    n = ypred.shape[0]
    yp = ypred.reshape(n, NUM_CH, 2)
    n_f = float(n)
    total = 0.0
    for ch in range(NUM_CH):
        w = WEIGHTS[ch]
        x0 = yp[:, ch, 0]
        x1 = yp[:, ch, 1]
        t = ytrue[:, ch]
        y = (t > FLOOR).astype(jnp.float32)
        class_err = jnp.mean(w * y * jax.nn.softplus(-x0)
                             + (1.0 - y) * jax.nn.softplus(x0))
        sq = (x1 - t) ** 2
        n_pos = jnp.sum(y)
        reg_pos = jnp.where(n_pos > 0,
                            w * jnp.sum(sq * y) / jnp.maximum(n_pos, 1.0), 0.0)
        reg_neg = jnp.where((n_pos > 0) & (n_pos < n_f),
                            jnp.sum(sq * (1.0 - y)) / jnp.maximum(n_f - n_pos, 1.0),
                            0.0)
        total = total + class_err + reg_pos + reg_neg
    return total


if __name__ == "__main__":
    key = jax.random.PRNGKey(0)
    k1, k2 = jax.random.split(key)
    N = 200  # not a multiple of the packing group -> exercises padding + ragged tail
    ypred = jax.random.normal(k1, (N, 14), dtype=jnp.float32)
    # shifted/scaled so some targets fall below the -20 floor
    ytrue = jax.random.normal(k2, (N, 7), dtype=jnp.float32) * 15.0 - 10.0

    loss = combined_loss(ypred, ytrue)
    jax.block_until_ready(loss)
    ref = _reference_loss(ypred, ytrue)
    assert jnp.allclose(loss, ref, rtol=1e-4, atol=1e-3), (loss, ref)

    # Multi-block + padded-N + ragged-last-block path with tiny tiles.
    loss2 = combined_loss(ypred[:150], ytrue[:150], group=8, tile_sr=8)
    jax.block_until_ready(loss2)
    ref2 = _reference_loss(ypred[:150], ytrue[:150])
    assert jnp.allclose(loss2, ref2, rtol=1e-4, atol=1e-3), (loss2, ref2)

    # Wider packing group (G=32 -> 448/224 lanes), single ragged block.
    loss3 = combined_loss(ypred, ytrue, group=32, tile_sr=8)
    jax.block_until_ready(loss3)
    assert jnp.allclose(loss3, ref, rtol=1e-4, atol=1e-3), (loss3, ref)

    print("KERNEL_OK")
</pallas_src>

<mosaic_0001>
module attributes {stable_mosaic.version = 11 : i64} {
  func.func @kernel(%arg0: i32, %arg1: memref<16x224xf32, #tpu.memory_space<vmem>>, %arg2: memref<16x112xf32, #tpu.memory_space<vmem>>, %arg3: memref<224x112xf32, #tpu.memory_space<vmem>>, %arg4: memref<224x112xf32, #tpu.memory_space<vmem>>, %arg5: memref<5x112xf32, #tpu.memory_space<vmem>>) attributes {dimension_semantics = [#tpu.dimension_semantics<arbitrary>], iteration_bounds = array<i64: 1>, scalar_prefetch = 0 : i64, scratch_operands = 0 : i64, tpu.core_type = #tpu.core_type<tc>, window_params = [{transform_indices = @transform_0, window_bounds = array<i64: 16, 224>}, {transform_indices = @transform_1, window_bounds = array<i64: 16, 112>}, {pipeline_mode = #tpu.pipeline_mode<synchronous>, transform_indices = @transform_2, window_bounds = array<i64: 224, 112>}, {pipeline_mode = #tpu.pipeline_mode<synchronous>, transform_indices = @transform_3, window_bounds = array<i64: 224, 112>}, {pipeline_mode = #tpu.pipeline_mode<synchronous>, transform_indices = @transform_4, window_bounds = array<i64: 5, 112>}]} {
    %c0_i32 = arith.constant 0 : i32
    %0 = arith.cmpi eq, %arg0, %c0_i32 : i32
    %1 = arith.extui %0 : i1 to i32
    %c0_i32_0 = arith.constant 0 : i32
    %2 = arith.cmpi ne, %1, %c0_i32_0 : i32
    scf.if %2 {
      %cst_25 = arith.constant 0.000000e+00 : f32
      %59 = vector.broadcast %cst_25 : f32 to vector<5x112xf32>
      %c0_26 = arith.constant 0 : index
      %c0_27 = arith.constant 0 : index
      %60 = vector.load %arg5[%c0_26, %c0_27] : memref<5x112xf32, #tpu.memory_space<vmem>>, vector<5x112xf32>
      tpu.vector_store %arg5[%c0_26, %c0_27], %59 {strides = array<i32>} : memref<5x112xf32, #tpu.memory_space<vmem>>, vector<5x112xf32>,
    } else {
    }
    %c0 = arith.constant 0 : index
    %c0_1 = arith.constant 0 : index
    %3 = vector.load %arg1[%c0, %c0_1] : memref<16x224xf32, #tpu.memory_space<vmem>>, vector<16x224xf32>
    %c0_2 = arith.constant 0 : index
    %c0_3 = arith.constant 0 : index
    %4 = vector.load %arg2[%c0_2, %c0_3] : memref<16x112xf32, #tpu.memory_space<vmem>>, vector<16x112xf32>
    %c16_i32 = arith.constant 16 : i32
    %5 = arith.muli %arg0, %c16_i32 : i32
    %6 = tpu.iota {dimensions = array<i32: 0>} : vector<16x1xi32>
    %7 = vector.broadcast %5 : i32 to vector<16x1xi32>
    %8 = arith.addi %7, %6 : vector<16x1xi32>
    %c13_i32 = arith.constant 13 : i32
    %9 = vector.broadcast %c13_i32 : i32 to vector<16x1xi32>
    %10 = arith.cmpi slt, %8, %9 : vector<16x1xi32>
    %cst = arith.constant -1.638400e+04 : f32
    %11 = vector.shape_cast %10 : vector<16x1xi1> to vector<16x1xi1>
    %12 = vector.broadcast %11 : vector<16x1xi1> to vector<16x224xi1>
    %13 = vector.broadcast %cst : f32 to vector<16x224xf32>
    %14 = arith.select %12, %3, %13 : vector<16x224xi1>, vector<16x224xf32>
    %cst_4 = arith.constant -1.638400e+04 : f32
    %15 = vector.shape_cast %10 : vector<16x1xi1> to vector<16x1xi1>
    %16 = vector.broadcast %15 : vector<16x1xi1> to vector<16x112xi1>
    %17 = vector.broadcast %cst_4 : f32 to vector<16x112xf32>
    %18 = arith.select %16, %4, %17 : vector<16x112xi1>, vector<16x112xf32>
    %c0_5 = arith.constant 0 : index
    %c0_6 = arith.constant 0 : index
    %19 = vector.load %arg3[%c0_5, %c0_6] : memref<224x112xf32, #tpu.memory_space<vmem>>, vector<224x112xf32>
    %cst_7 = arith.constant dense<0.000000e+00> : vector<16x112xf32>
    %20 = tpu.matmul %14, %19, %cst_7 {dimension_numbers = #tpu.dot_dimension_numbers<[1], [0], [0], [1], [0, 0, 1, 1], [], []>, precision = #tpu.contract_precision<fp32>} : vector<16x224xf32>, vector<224x112xf32>, vector<16x112xf32> -> vector<16x112xf32>
    %c0_8 = arith.constant 0 : index
    %c0_9 = arith.constant 0 : index
    %21 = vector.load %arg4[%c0_8, %c0_9] : memref<224x112xf32, #tpu.memory_space<vmem>>, vector<224x112xf32>
    %cst_10 = arith.constant dense<0.000000e+00> : vector<16x112xf32>
    %22 = tpu.matmul %14, %21, %cst_10 {dimension_numbers = #tpu.dot_dimension_numbers<[1], [0], [0], [1], [0, 0, 1, 1], [], []>, precision = #tpu.contract_precision<fp32>} : vector<16x224xf32>, vector<224x112xf32>, vector<16x112xf32> -> vector<16x112xf32>
    %cst_11 = arith.constant -2.000000e+01 : f32
    %23 = vector.broadcast %cst_11 : f32 to vector<16x112xf32>
    %24 = arith.cmpf ogt, %18, %23 : vector<16x112xf32>
    %25 = arith.extui %24 : vector<16x112xi1> to vector<16x112xi32>
    %26 = arith.sitofp %25 : vector<16x112xi32> to vector<16x112xf32>
    %cst_12 = arith.constant 0.000000e+00 : f32
    %27 = vector.broadcast %cst_12 : f32 to vector<16x112xf32>
    %28 = arith.subf %27, %20 : vector<16x112xf32>
    %cst_13 = arith.constant 0.000000e+00 : f32
    %29 = vector.broadcast %cst_13 : f32 to vector<16x112xf32>
    %30 = arith.maximumf %28, %29 : vector<16x112xf32>
    %31 = math.absf %20 : vector<16x112xf32>
    %cst_14 = arith.constant 0.000000e+00 : f32
    %32 = vector.broadcast %cst_14 : f32 to vector<16x112xf32>
    %33 = arith.subf %32, %31 : vector<16x112xf32>
    %34 = math.exp %33 : vector<16x112xf32>
    %35 = math.log1p %34 : vector<16x112xf32>
    %36 = arith.addf %30, %35 : vector<16x112xf32>
    %37 = arith.subf %22, %18 : vector<16x112xf32>
    %38 = arith.mulf %37, %37 : vector<16x112xf32>
    %39 = arith.mulf %26, %36 : vector<16x112xf32>
    %cst_15 = arith.constant dense<0.000000e+00> : vector<112xf32>
    %40 = vector.multi_reduction <add>, %39, %cst_15 [0] : vector<16x112xf32> to vector<112xf32>
    %41 = vector.shape_cast %40 : vector<112xf32> to vector<1x112xf32>
    %cst_16 = arith.constant 1.000000e+00 : f32
    %42 = vector.broadcast %cst_16 : f32 to vector<16x112xf32>
    %43 = arith.subf %42, %26 : vector<16x112xf32>
    %44 = arith.addf %36, %20 : vector<16x112xf32>
    %45 = arith.mulf %43, %44 : vector<16x112xf32>
    %cst_17 = arith.constant dense<0.000000e+00> : vector<112xf32>
    %46 = vector.multi_reduction <add>, %45, %cst_17 [0] : vector<16x112xf32> to vector<112xf32>
    %47 = vector.shape_cast %46 : vector<112xf32> to vector<1x112xf32>
    %cst_18 = arith.constant dense<0.000000e+00> : vector<112xf32>
    %48 = vector.multi_reduction <add>, %26, %cst_18 [0] : vector<16x112xf32> to vector<112xf32>
    %49 = vector.shape_cast %48 : vector<112xf32> to vector<1x112xf32>
    %50 = arith.mulf %38, %26 : vector<16x112xf32>
    %cst_19 = arith.constant dense<0.000000e+00> : vector<112xf32>
    %51 = vector.multi_reduction <add>, %50, %cst_19 [0] : vector<16x112xf32> to vector<112xf32>
    %52 = vector.shape_cast %51 : vector<112xf32> to vector<1x112xf32>
    %cst_20 = arith.constant dense<0.000000e+00> : vector<112xf32>
    %53 = vector.multi_reduction <add>, %38, %cst_20 [0] : vector<16x112xf32> to vector<112xf32>
    %54 = vector.shape_cast %53 : vector<112xf32> to vector<1x112xf32>
    %c0_21 = arith.constant 0 : index
    %c0_22 = arith.constant 0 : index
    %55 = vector.load %arg5[%c0_21, %c0_22] : memref<5x112xf32, #tpu.memory_space<vmem>>, vector<5x112xf32>
    %56 = tpu.concatenate %41, %47, %49, %52, %54 in 0 : vector<1x112xf32>, vector<1x112xf32>, vector<1x112xf32>, vector<1x112xf32>, vector<1x112xf32> -> vector<5x112xf32>
    %57 = arith.addf %55, %56 : vector<5x112xf32>
    %c0_23 = arith.constant 0 : index
    %c0_24 = arith.constant 0 : index
    %58 = vector.load %arg5[%c0_23, %c0_24] : memref<5x112xf32, #tpu.memory_space<vmem>>, vector<5x112xf32>
    tpu.vector_store %arg5[%c0_23, %c0_24], %57 {strides = array<i32>} : memref<5x112xf32, #tpu.memory_space<vmem>>, vector<5x112xf32>,
    return
  }
  func.func @transform_0(%arg0: i32) -> (i32, i32) {
    %c0_i32 = arith.constant 0 : i32
    %c0_i32_0 = arith.constant 0 : i32
    return %arg0, %c0_i32 : i32, i32
  }
  func.func @transform_1(%arg0: i32) -> (i32, i32) {
    %c0_i32 = arith.constant 0 : i32
    %c0_i32_0 = arith.constant 0 : i32
    return %arg0, %c0_i32 : i32, i32
  }
  func.func @transform_2(%arg0: i32) -> (i32, i32) {
    %c0_i32 = arith.constant 0 : i32
    %c0_i32_0 = arith.constant 0 : i32
    %c0_i32_1 = arith.constant 0 : i32
    return %c0_i32, %c0_i32_0 : i32, i32
  }
  func.func @transform_3(%arg0: i32) -> (i32, i32) {
    %c0_i32 = arith.constant 0 : i32
    %c0_i32_0 = arith.constant 0 : i32
    %c0_i32_1 = arith.constant 0 : i32
    return %c0_i32, %c0_i32_0 : i32, i32
  }
  func.func @transform_4(%arg0: i32) -> (i32, i32) {
    %c0_i32 = arith.constant 0 : i32
    %c0_i32_0 = arith.constant 0 : i32
    %c0_i32_1 = arith.constant 0 : i32
    return %c0_i32, %c0_i32_0 : i32, i32
  }
}

</mosaic_0001>

<bundles_post_ra>
// kernel: tpu_custom_call.1
= control target key start
LH: loop header
LB: loop body
LE: loop exit
PB: predicated region body
PF: predicated region fallthrough
CT: control target
= control target key end

     0   :  { %9 = vsyncpa [#allocation3], 0  ;;  %s4101_s0 = inlined_call_operand.hbm [shape: f32[13,224], index: 0, kind: input, shape index: {}]   ;;  %s4102_s1 = inlined_call_operand.hbm [shape: f32[13,112], index: 1, kind: input, shape index: {}]   ;;  %s4103_s2 = inlined_call_operand.hbm [shape: f32[224,112], index: 2, kind: input, shape index: {}]   ;;  %s4104_s3 = inlined_call_operand.hbm [shape: f32[224,112], index: 3, kind: input, shape index: {}]   ;;  %s4105_s4 = inlined_call_operand.hbm [shape: f32[5,112], index: 4, kind: output, shape index: {}]  }
   0x1   :  { %10 = vsyncpa [#allocation6], 0 }
   0x2   :  { %11 = vsyncpa [#allocation9], 0 }
   0x3   :  { %12 = vsyncpa [#allocation4], 0  ;;  %s2709_s15 = smov [#allocation5]   ;;  %s2591_s19 = scalar_lea.hbm %s4102_s1, 256 }
   0x4   :  { %s30_s16 = sshll.u32 %s2709_s15, 4  ;;  %p2592_p0 = scmp.ne.s32.totalorder %s4102_s1, %s2591_s19  ;;  %s31_s16 = int_to_ptr.vmem [resolvable:$true] %s30_s16 }
   0x5   :  { %p2595_p1 = scmp.lt.u32.totalorder %s2591_s19, %s4102_s1 }
   0x7   :  { %p2597_p2 = pnand %p2595_p1, %p2592_p0 }
   0x9   :  { %2600 = shalt.err (!%p2597_p2)
}
   0xa   :  { %s2601_s24 = scalar_lea.vmem %s31_s16, 256  ;;  %p2606_p4 = scmp.lt.s32.totalorder %s31_s16, %s31_s16 }
   0xb   :  { %p2602_p3 = scmp.ne.s32.totalorder %s31_s16, %s2601_s24  ;;  %p2607_p5 = scmp.lt.s32.totalorder %s2601_s24, %s2601_s24 }
   0xd   :  { %p2608_p6 = por %p2607_p5, %p2606_p4 }
   0xf   :  { %p2609_p7 = pnand %p2608_p6, %p2602_p3 }
  0x11   :  { %2612 = shalt.err (!%p2609_p7)
}
  0x12   :  { %s2710_s25 = smov 128   ;;  %s2711_s26 = smov 8  }
  0x13   :  { %36 = dma.hbm_to_vmem [thread:$0]  %s4102_s1, 256, %s31_s16, [#allocation6], %s2710_s25, %s2710_s25, %s2711_s26  }
  0x14   :  { %s2712_s29 = smov [#allocation2]   ;;  %s2613_s7 = scalar_lea.hbm %s4101_s0, 512 }
  0x15   :  { %s18_s30 = sshll.u32 %s2712_s29, 4  ;;  %p2614_p8 = scmp.ne.s32.totalorder %s4101_s0, %s2613_s7  ;;  %s19_s30 = int_to_ptr.vmem [resolvable:$true] %s18_s30 }
  0x16   :  { %p2617_p9 = scmp.lt.u32.totalorder %s2613_s7, %s4101_s0 }
  0x18   :  { %p2619_p10 = pnand %p2617_p9, %p2614_p8 }
  0x1a   :  { %2622 = shalt.err (!%p2619_p10)
}
  0x1b   :  { %s2623_s12 = scalar_lea.vmem %s19_s30, 512  ;;  %p2628_p12 = scmp.lt.s32.totalorder %s19_s30, %s19_s30 }
  0x1c   :  { %p2624_p11 = scmp.ne.s32.totalorder %s19_s30, %s2623_s12  ;;  %p2629_p13 = scmp.lt.s32.totalorder %s2623_s12, %s2623_s12 }
  0x1e   :  { %p2630_p0 = por %p2629_p13, %p2628_p12 }
  0x20   :  { %p2631_p1 = pnand %p2630_p0, %p2624_p11 }
  0x22   :  { %2634 = shalt.err (!%p2631_p1)
}
  0x23   :  { %s2713_s1 = smov 256   ;;  %s2714_s13 = smov 16  }
  0x24   :  { %24 = dma.hbm_to_vmem [thread:$0]  %s4101_s0, 512, %s19_s30, [#allocation3], %s2713_s1, %s2713_s1, %s2714_s13  }
  0x25   :  { %s2715_s16 = smov [#allocation7]   ;;  %s2716_s18 = smov [#allocation8]  }
  0x26   :  { %s42_s17 = sshll.u32 %s2715_s16, 4  ;;  %s54_s19 = sshll.u32 %s2716_s18, 4  ;;  %s43_s17 = int_to_ptr.vmem [resolvable:$true] %s42_s17  ;;  %s2772_s19 = int_to_ptr.vmem [resolvable:$true] %s54_s19 }
  0x27   :  { %s2635_s22 = scalar_lea.hbm %s4103_s2, 3584 }
  0x28   :  { %p2636_p2 = scmp.ne.s32.totalorder %s4103_s2, %s2635_s22  ;;  %p2639_p3 = scmp.lt.u32.totalorder %s2635_s22, %s4103_s2 }
  0x2a   :  { %p2641_p4 = pnand %p2639_p3, %p2636_p2 }
  0x2c   :  { %2644 = shalt.err (!%p2641_p4)
}
  0x2d   :  { %s2645_s0 = scalar_lea.vmem %s43_s17, 3584  ;;  %p2650_p6 = scmp.lt.s32.totalorder %s43_s17, %s43_s17 }
  0x2e   :  { %p2646_p5 = scmp.ne.s32.totalorder %s43_s17, %s2645_s0  ;;  %p2651_p7 = scmp.lt.s32.totalorder %s2645_s0, %s2645_s0 }
  0x30   :  { %p2652_p8 = por %p2651_p7, %p2650_p6 }
  0x32   :  { %p2653_p9 = pnand %p2652_p8, %p2646_p5 }
  0x34   :  { %2656 = shalt.err (!%p2653_p9)
}
  0x35   :  { %48 = dma.hbm_to_vmem [thread:$0]  %s4103_s2, 3584, %s43_s17, [#allocation6], %s2710_s25, %s2710_s25, %s2711_s26  }
  0x36   :  { %s2657_s7 = scalar_lea.hbm %s4104_s3, 3584 }
  0x37   :  { %p2658_p10 = scmp.ne.s32.totalorder %s4104_s3, %s2657_s7  ;;  %p2661_p11 = scmp.lt.u32.totalorder %s2657_s7, %s4104_s3 }
  0x39   :  { %p2663_p12 = pnand %p2661_p11, %p2658_p10 }
  0x3b   :  { %2666 = shalt.err (!%p2663_p12)
}
  0x3c   :  { %s2667_s12 = scalar_lea.vmem %s2772_s19, 3584  ;;  %p2672_p0 = scmp.lt.s32.totalorder %s2772_s19, %s2772_s19 }
  0x3d   :  { %p2668_p13 = scmp.ne.s32.totalorder %s2772_s19, %s2667_s12  ;;  %p2673_p1 = scmp.lt.s32.totalorder %s2667_s12, %s2667_s12 }
  0x3f   :  { %p2674_p2 = por %p2673_p1, %p2672_p0 }
  0x41   :  { %p2675_p3 = pnand %p2674_p2, %p2668_p13 }
  0x43   :  { %2678 = shalt.err (!%p2675_p3)
}
  0x44   :  { %60 = dma.hbm_to_vmem [thread:$0]  %s4104_s3, 3584, %s2772_s19, [#allocation9], %s2710_s25, %s2710_s25, %s2711_s26  }
  0x45   :  { %2701 = dma.done.wait [#allocation3], 512  }
  0x46   :  { %2702 = vsyncadd [#allocation3], 4294966784 }
  0x47   :  { %2703 = dma.done.wait [#allocation6], 3840  }
  0x48   :  { %2704 = vsyncadd [#allocation6], 4294963456 }
  0x49   :  { %2705 = dma.done.wait [#allocation9], 3584  }
  0x4a   :  { %2706 = vsyncadd [#allocation9], 4294963712  ;;  %v4124_v0 = vmov 0.0|0.0   ;;  %v2811_v1 = vld [vmem:[#allocation7] sm:$0xff]  ;;  %v2813_v2 = vld [vmem:[#allocation7 + $0x8] sm:$0xff]  ;;  %v86_v46 = vlaneseq  ;;  %vm132_vm0 = vcmask 785408  }
  0x4b   :  { %2028 = vmatprep.subr.bf16.mxu0 %v4124_v0  ;;  %2280 = vmatprep.subr.bf16.mxu1 %v4124_v0  ;;  %v2815_v3 = vld [vmem:[#allocation8] sm:$0xff]  ;;  %v140_v4 = vand.u32 4294901760, %v2811_v1  ;;  %v143_v5 = vand.u32 4294901760, %v2813_v2  ;;  %v2819_v6 = vld [vmem:[#allocation8 + $0x8] sm:$0xff]  ;;  %v2822_v8 = vld [vmem:[#allocation7 + $0x10] sm:$0xff]  ;;  %vm77_vm2 = vcmask 913408  }
  0x4c   :  { %v1034_v7 = vand.u32 4294901760, %v2815_v3  ;;  %v2824_v9 = vld [vmem:[#allocation7 + $0x18] sm:$0xff]  ;;  %v1037_v10 = vand.u32 4294901760, %v2819_v6  ;;  %v146_v11 = vand.u32 4294901760, %v2822_v8  ;;  %v2829_v13 = vld [vmem:[#allocation8 + $0x10] sm:$0xff]  ;;  %v2833_v15 = vld [vmem:[#allocation7 + $0x20] sm:$0xff] }
  0x4d   :  { %v149_v12 = vand.u32 4294901760, %v2824_v9  ;;  %v2831_v14 = vld [vmem:[#allocation8 + $0x18] sm:$0xff]  ;;  %v2839_v16 = vpack.c.bf16 %v143_v5, %v140_v4  ;;  %v2841_v17 = vld [vmem:[#allocation7 + $0x28] sm:$0xff]  ;;  %v2843_v18 = vld [vmem:[#allocation8 + $0x20] sm:$0xff]  ;;  %v1040_v22 = vand.u32 4294901760, %v2829_v13  ;;  %v152_v24 = vand.u32 4294901760, %v2833_v15 }
  0x4e   :  { %v2845_v19 = vld [vmem:[#allocation8 + $0x28] sm:$0xff]  ;;  %v2851_v20 = vpack.c.bf16 %v1037_v10, %v1034_v7  ;;  %v1043_v23 = vand.u32 4294901760, %v2831_v14  ;;  %v155_v25 = vand.u32 4294901760, %v2841_v17  ;;  %v1046_v26 = vand.u32 4294901760, %v2843_v18  ;;  %v2868_v28 = vld [vmem:[#allocation7 + $0x30] sm:$0xff]  ;;  %v2870_v29 = vld [vmem:[#allocation7 + $0x38] sm:$0xff] }
  0x4f   :  { %4276 = vst [vmem:[#allocation15_spill] sm:$0xff] %v2839_v16  ;;  %2030 = vmatpush1.bf16.msra.mxu0 %v2839_v16  ;;  %v2858_v21 = vpack.c.bf16 %v149_v12, %v146_v11  ;;  %v1049_v27 = vand.u32 4294901760, %v2845_v19  ;;  %v2879_v31 = vld [vmem:[#allocation8 + $0x30] sm:$0xff]  ;;  %v2881_v32 = vld [vmem:[#allocation8 + $0x38] sm:$0xff]  ;;  %v4117_v34 = vand.u32 4294901760, %v2868_v28  ;;  %v4114_v35 = vand.u32 4294901760, %v2870_v29 }
  0x50   :  { %4277 = vst [vmem:[#allocation16_spill] sm:$0xff] %v2851_v20  ;;  %2282 = vmatpush1.bf16.msra.mxu1 %v2851_v20  ;;  %2031 = vmatprep.subr.bf16.mxu0 %v4124_v0  ;;  %v2877_v30 = vpack.c.bf16 %v1043_v23, %v1040_v22  ;;  %v2888_v33 = vpack.c.bf16 %v155_v25, %v152_v24  ;;  %v4113_v37 = vand.u32 4294901760, %v2879_v31  ;;  %v4110_v38 = vand.u32 4294901760, %v2881_v32  ;;  %v2902_v39 = vld [vmem:[#allocation7 + $0x40] sm:$0xff]  ;;  %v2904_v40 = vld [vmem:[#allocation7 + $0x48] sm:$0xff]  ;;  %v2930_v50 = vld [vmem:[#allocation7 + $0x50] sm:$0xff] }
  0x51   :  { %4278 = vst [vmem:[#allocation17_spill] sm:$0xff] %v2858_v21  ;;  %2283 = vmatprep.subr.bf16.mxu1 %v4124_v0  ;;  %v2898_v36 = vpack.c.bf16 %v1049_v27, %v1046_v26  ;;  %v2907_v41 = vld [vmem:[#allocation8 + $0x40] sm:$0xff]  ;;  %v2909_v42 = vld [vmem:[#allocation8 + $0x48] sm:$0xff]  ;;  %v2916_v43 = vpack.c.bf16 %v4114_v35, %v4117_v34  ;;  %v4109_v44 = vand.u32 4294901760, %v2902_v39  ;;  %v4108_v45 = vand.u32 4294901760, %v2904_v40  ;;  %v2932_v51 = vld [vmem:[#allocation7 + $0x58] sm:$0xff] }
  0x52   :  { %4279 = vst [vmem:[#allocation18_spill] sm:$0xff] %v2877_v30  ;;  %4280 = vst [vmem:[#allocation19_spill] sm:$0xff] %v2888_v33  ;;  %v2926_v47 = vpack.c.bf16 %v4110_v38, %v4113_v37  ;;  %v4107_v48 = vand.u32 4294901760, %v2907_v41  ;;  %v4106_v49 = vand.u32 4294901760, %v2909_v42  ;;  %v2935_v52 = vld [vmem:[#allocation8 + $0x50] sm:$0xff]  ;;  %v2937_v53 = vld [vmem:[#allocation8 + $0x58] sm:$0xff]  ;;  %v2981_v38 = vsub.f32 %v2811_v1, %v140_v4 }
  0x53   :  { %2033 = vmatpush1.bf16.msra.mxu0 %v2858_v21  ;;  %4281 = vst [vmem:[#allocation20_spill] sm:$0xff] %v2898_v36  ;;  %4282 = vst [vmem:[#allocation21_spill] sm:$0xff] %v2916_v43  ;;  %v2944_v54 = vpack.c.bf16 %v4108_v45, %v4109_v44  ;;  %v4112_v55 = vand.u32 4294901760, %v2930_v50  ;;  %v4111_v56 = vand.u32 4294901760, %v2932_v51  ;;  %v87_v57 = vshrl.u32 %v86_v46, 7  ;;  %v2958_v61 = vld [vmem:[#allocation7 + $0x60] sm:$0xff] }
  0x54   :  { %2285 = vmatpush1.bf16.msra.mxu1 %v2877_v30  ;;  %2034 = vmatprep.subr.bf16.mxu0 %v4124_v0  ;;  %4283 = vst [vmem:[#allocation22_spill] sm:$0xff] %v2926_v47  ;;  %v2954_v58 = vpack.c.bf16 %v4106_v49, %v4107_v48  ;;  %v4116_v59 = vand.u32 4294901760, %v2935_v52  ;;  %v4115_v60 = vand.u32 4294901760, %v2937_v53  ;;  %v2960_v62 = vld [vmem:[#allocation7 + $0x68] sm:$0xff]  ;;  %v2963_v63 = vld [vmem:[#allocation8 + $0x60] sm:$0xff]  ;;  %v4119_v48 = vand.u32 4294901760, %v2958_v61 }
  0x55   :  { %2286 = vmatprep.subr.bf16.mxu1 %v4124_v0  ;;  %4284 = vst [vmem:[#allocation23_spill] sm:$0xff] %v2944_v54  ;;  %v2965_v46 = vld [vmem:[#allocation8 + $0x68] sm:$0xff]  ;;  %v2972_v49 = vpack.c.bf16 %v4111_v56, %v4112_v55  ;;  %v4118_v45 = vand.u32 4294901760, %v2960_v62  ;;  %v2976_v44 = vadd.s32 8, %v87_v57  ;;  %4288 = vst [vmem:[#allocation27_spill] sm:$0xff] %v2981_v38  ;;  %v1070_v55 = vand.u32 4294901760, %v2963_v63 }
  0x56   :  { %4285 = vst [vmem:[#allocation24_spill] sm:$0xff] %v2954_v58  ;;  %v2989_v56 = vpack.c.bf16 %v4115_v60, %v4116_v59  ;;  %v1073_v57 = vand.u32 4294901760, %v2965_v46  ;;  %v118_v37 = vld [vmem:[#allocation7 + $0x70] sm:$0xff]  ;;  %v119_v35 = vld [vmem:[#allocation7 + $0x78] sm:$0xff]  ;;  %v2996_v1 = vsub.f32 %v2813_v2, %v143_v5  ;;  %v3001_v4 = vsub.f32 %v2815_v3, %v1034_v7  ;;  %v124_v16 = vld [vmem:[#allocation7 + $0xa0] sm:$0xff]  ;;  %s2719_s3 = smov [#allocation10]  }
  0x57   :  { %2036 = vmatpush1.bf16.msra.mxu0 %v2888_v33  ;;  %4286 = vst [vmem:[#allocation25_spill] sm:$0xff] %v2972_v49  ;;  %4287 = vst [vmem:[#allocation26_spill] sm:$0xff] %v2976_v44  ;;  %v3006_v60 = vsub.f32 %v2819_v6, %v1037_v10  ;;  %v3011_v59 = vsub.f32 %v2822_v8, %v146_v11  ;;  %v3014_v34 = vld [vmem:[#allocation8 + $0x70] sm:$0xff]  ;;  %v3016_v2 = vld [vmem:[#allocation8 + $0x78] sm:$0xff]  ;;  %v3021_v3 = vsub.f32 %v2824_v9, %v149_v12  ;;  %vm1943_vm5 = vcmask 916480   ;;  %s2015_s25 = sshll.u32 %s2719_s3, 4  ;;  %s2016_s25 = int_to_ptr.vmem [resolvable:$true] %s2015_s25 }
  0x58   :  { %2288 = vmatpush1.bf16.msra.mxu1 %v2898_v36  ;;  %2037 = vmatprep.subr.bf16.mxu0 %v4124_v0  ;;  %4289 = vst [vmem:[#allocation28_spill] sm:$0xff] %v2989_v56  ;;  %4290 = vst [vmem:[#allocation29_spill] sm:$0xff] %v2996_v1  ;;  %v3026_v5 = vsub.f32 %v2829_v13, %v1040_v22  ;;  %v3031_v6 = vsub.f32 %v2831_v14, %v1043_v23  ;;  %v182_v10 = vand.u32 4294901760, %v118_v37  ;;  %v121_v22 = vld [vmem:[#allocation7 + $0x88] sm:$0xff]  ;;  %v1023_v30 = vld [vmem:[#allocation8 + $0x90] sm:$0xff]  ;;  %vm1998_vm8 = vcmask 1040384   ;;  %p2684_p5 = scmp.lt.s32.totalorder %s2016_s25, %s2016_s25 }
  0x59   :  { %2289 = vmatprep.subr.bf16.mxu1 %v4124_v0  ;;  %4291 = vst [vmem:[#allocation30_spill] sm:$0xff] %v3001_v4  ;;  %4292 = vst [vmem:[#allocation31_spill] sm:$0xff] %v3006_v60  ;;  %v3036_v7 = vsub.f32 %v2833_v15, %v152_v24  ;;  %v3041_v8 = vsub.f32 %v2841_v17, %v155_v25  ;;  %v3048_v9 = vpack.c.bf16 %v4118_v45, %v4119_v48  ;;  %v120_v17 = vld [vmem:[#allocation7 + $0x80] sm:$0xff]  ;;  %vm2000_vm9 = vcmask 1041408   ;;  %s2679_s26 = scalar_lea.vmem %s2016_s25, 128 }
  0x5a   :  { %4293 = vst [vmem:[#allocation32_spill] sm:$0xff] %v3011_v59  ;;  %4294 = vst [vmem:[#allocation33_spill] sm:$0xff] %v3021_v3  ;;  %v185_v11 = vand.u32 4294901760, %v119_v35  ;;  %v3053_v12 = vsub.f32 %v2843_v18, %v1046_v26  ;;  %v3057_v13 = vpack.c.bf16 %v1073_v57, %v1070_v55  ;;  %v1076_v14 = vand.u32 4294901760, %v3014_v34  ;;  %p2680_p4 = scmp.ne.s32.totalorder %s2016_s25, %s2679_s26  ;;  %p2685_p6 = scmp.lt.s32.totalorder %s2679_s26, %s2679_s26 }
  0x5b   :  { %2039 = vmatpush1.bf16.msra.mxu0 %v2916_v43  ;;  %4295 = vst [vmem:[#allocation34_spill] sm:$0xff] %v3026_v5  ;;  %4296 = vst [vmem:[#allocation35_spill] sm:$0xff] %v3031_v6  ;;  %v1079_v15 = vand.u32 4294901760, %v3016_v2  ;;  %v3064_v23 = vsub.f32 %v2845_v19, %v1049_v27  ;;  %v4299_v18 = vand.u32 4294901760, %v2868_v28  ;;  %v4300_v25 = vand.u32 4294901760, %v2870_v29  ;;  %v1022_v19 = vld [vmem:[#allocation8 + $0x88] sm:$0xff] }
  0x5c   :  { %2291 = vmatpush1.bf16.msra.mxu1 %v2926_v47  ;;  %2040 = vmatprep.subr.bf16.mxu0 %v4124_v0  ;;  %4297 = vst [vmem:[#allocation36_spill] sm:$0xff] %v3048_v9  ;;  %4298 = vst [vmem:[#allocation37_spill] sm:$0xff] %v3057_v13  ;;  %v4302_v45 = vand.u32 4294901760, %v2879_v31  ;;  %v4303_v27 = vand.u32 4294901760, %v2881_v32  ;;  %v4315_v43 = vand.u32 4294901760, %v2935_v52  ;;  %v4317_v36 = vand.u32 4294901760, %v2958_v61  ;;  %p2686_p7 = por %p2685_p6, %p2684_p5 }
  0x5d   :  { %2292 = vmatprep.subr.bf16.mxu1 %v4124_v0  ;;  %v3069_v24 = vsub.f32 %v2868_v28, %v4299_v18  ;;  %v3074_v26 = vsub.f32 %v2870_v29, %v4300_v25  ;;  %v4304_v28 = vand.u32 4294901760, %v2902_v39  ;;  %v4305_v29 = vand.u32 4294901760, %v2904_v40 }
  0x5e   :  { %v3079_v48 = vsub.f32 %v2879_v31, %v4302_v45  ;;  %v4306_v31 = vand.u32 4294901760, %v2907_v41  ;;  %v3137_v33 = vsub.f32 %v2958_v61, %v4317_v36  ;;  %v3154_v36 = vsub.f32 %v119_v35, %v185_v11  ;;  %v1025_v35 = vld [vmem:[#allocation8 + $0xa0] sm:$0xff]  ;;  %p2687_p8 = pnand %p2686_p7, %p2680_p4 }
  0x5f   :  { %2042 = vmatpush1.bf16.msra.mxu0 %v2944_v54  ;;  %4301 = vst [vmem:[#allocation38_spill] sm:$0xff] %v3074_v26  ;;  %v3090_v18 = vsub.f32 %v2902_v39, %v4304_v28  ;;  %v3095_v25 = vsub.f32 %v2904_v40, %v4305_v29  ;;  %v188_v39 = vand.u32 4294901760, %v120_v17  ;;  %v191_v28 = vand.u32 4294901760, %v121_v22  ;;  %v123_v54 = vld [vmem:[#allocation7 + $0x98] sm:$0xff] }
  0x60   :  { %2294 = vmatpush1.bf16.msra.mxu1 %v2954_v58  ;;  %2043 = vmatprep.subr.bf16.mxu0 %v4124_v0  ;;  %v3100_v45 = vsub.f32 %v2907_v41, %v4306_v31  ;;  %v4310_v58 = vand.u32 4294901760, %v2930_v50  ;;  %v4312_v41 = vmov 0.0|0.0   ;;  %v3117_v29 = vpack.c.bf16 %v1079_v15, %v1076_v14  ;;  %4318 = vst [vmem:[#allocation43_spill] sm:$0xff] %v3137_v33  ;;  %4323 = vst [vmem:[#allocation47_spill] sm:$0xff] %v3154_v36  ;;  %v125_v33 = vld [vmem:[#allocation7 + $0xa8] sm:$0xff] }
  0x61   :  { %2295 = vmatprep.subr.bf16.mxu1 %v4124_v0  ;;  %v3156_v61 = vpack.c.bf16 %v191_v28, %v188_v39  ;;  %v197_v20 = vand.u32 4294901760, %v123_v54  ;;  %v203_v36 = vand.u32 4294901760, %v125_v33  ;;  %vm93_vm1 = vcmp.lt.s32.totalorder %v2976_v44, 13 }
  0x62   :  { %v3113_v40 = vsub.f32 %v2930_v50, %v4310_v58  ;;  %4313 = vst [vmem:[#allocation42_spill] sm:$0xff] %v3117_v29  ;;  %v3127_v50 = vsub.f32 %v2935_v52, %v4315_v43  ;;  %v4316_v58 = vand.u32 4294901760, %v2937_v53  ;;  %v3146_v43 = vsub.f32 %v2963_v63, %v1070_v55 }
  0x63   :  { %2045 = vmatpush1.bf16.msra.mxu0 %v2972_v49  ;;  %v3085_v49 = vsub.f32 %v2881_v32, %v4303_v27  ;;  %v3108_v27 = vpack.c.bf16 %v185_v11, %v182_v10  ;;  %v3149_v52 = vsub.f32 %v2965_v46, %v1073_v57  ;;  %4324 = vst [vmem:[#allocation48_spill] sm:$0xff] %v3156_v61  ;;  %v1088_v63 = vand.u32 4294901760, %v1023_v30  ;;  %v1026_v57 = vld [vmem:[#allocation8 + $0xa8] sm:$0xff] }
  0x64   :  { %2297 = vmatpush1.bf16.msra.mxu1 %v2989_v56  ;;  %2046 = vmatprep.subr.bf16.mxu0 %v4124_v0  ;;  %v1021_v56 = vld [vmem:[#allocation8 + $0x80] sm:$0xff]  ;;  %4311 = vst [vmem:[#allocation41_spill] sm:$0xff] %v3113_v40  ;;  %v3160_v55 = vsub.f32 %v3014_v34, %v1076_v14  ;;  %v3169_v11 = vsub.f32 %v120_v17, %v188_v39  ;;  %v126_v34 = vld [vmem:[#allocation7 + $0xb0] sm:$0xff]  ;;  %v127_v14 = vld [vmem:[#allocation7 + $0xb8] sm:$0xff]  ;;  %v1097_v17 = vand.u32 4294901760, %v1026_v57  ;;  %vm2002_vm10 = vcmask 1042432  }
  0x65   :  { %2298 = vmatprep.subr.bf16.mxu1 %v4124_v0  ;;  %v4307_v0 = vand.u32 4294901760, %v2909_v42  ;;  %4309 = vst [vmem:[#allocation40_spill] sm:$0xff] %v3108_v27  ;;  %v1082_v31 = vand.u32 4294901760, %v1021_v56  ;;  %4321 = vst [vmem:[#allocation45_spill] sm:$0xff] %v3149_v52  ;;  %v79_v52 = vld [vmem:[#allocation2] sm:$0xff]  ;;  %vm2004_vm11 = vcmask 1043456  }
  0x66   :  { %4325 = vst [vmem:[#allocation49_spill] sm:$0xff] %v3160_v55  ;;  %4328 = vst [vmem:[#allocation52_spill] sm:$0xff] %v3169_v11  ;;  %v200_v55 = vand.u32 4294901760, %v124_v16 }
  0x67   :  { %v3105_v32 = vsub.f32 %v2909_v42, %v4307_v0  ;;  %2048 = vmatpush1.bf16.msra.mxu0 %v3048_v9  ;;  %v1085_v0 = vand.u32 4294901760, %v1022_v19  ;;  %v122_v42 = vld [vmem:[#allocation7 + $0x90] sm:$0xff]  ;;  %v4314_v9 = vand.u32 4294901760, %v2932_v51 }
  0x68   :  { %2300 = vmatpush1.bf16.msra.mxu1 %v3057_v13  ;;  %2049 = vmatprep.subr.bf16.mxu0 %v4312_v41  ;;  %v3132_v13 = vsub.f32 %v2937_v53, %v4316_v58  ;;  %v3151_v53 = vsub.f32 %v118_v37, %v182_v10  ;;  %v194_v58 = vand.u32 4294901760, %v122_v42  ;;  %v3166_v10 = vsub.f32 %v3016_v2, %v1079_v15 }
  0x69   :  { %4308 = vst [vmem:[#allocation39_spill] sm:$0xff] %v3105_v32  ;;  %v3122_v47 = vsub.f32 %v2932_v51, %v4314_v9  ;;  %2301 = vmatprep.subr.bf16.mxu1 %v4312_v41  ;;  %v1024_v51 = vld [vmem:[#allocation8 + $0x98] sm:$0xff]  ;;  %v4319_v9 = vand.u32 4294901760, %v2960_v62  ;;  %v3163_v37 = vpack.c.bf16 %v1085_v0, %v1082_v31  ;;  %v1094_v15 = vand.u32 4294901760, %v1025_v35 }
  0x6a   :  { %4322 = vst [vmem:[#allocation46_spill] sm:$0xff] %v3151_v53  ;;  %v1091_v46 = vand.u32 4294901760, %v1024_v51  ;;  %4327 = vst [vmem:[#allocation51_spill] sm:$0xff] %v3166_v10  ;;  %v3179_v2 = vpack.c.bf16 %v197_v20, %v194_v58 }
  0x6b   :  { %v3143_v21 = vsub.f32 %v2960_v62, %v4319_v9  ;;  %2051 = vmatpush1.bf16.msra.mxu0 %v3108_v27  ;;  %v80_v62 = vld [vmem:[#allocation2 + $0x8] sm:$0xff]  ;;  %4326 = vst [vmem:[#allocation50_spill] sm:$0xff] %v3163_v37  ;;  %v3171_v9 = vsub.f32 %v121_v22, %v191_v28  ;;  %v3175_v27 = vsub.f32 %v1022_v19, %v1085_v0  ;;  %v206_v19 = vand.u32 4294901760, %v126_v34 }
  0x6c   :  { %2303 = vmatpush1.bf16.msra.mxu1 %v3117_v29  ;;  %2052 = vmatprep.subr.bf16.mxu0 %v4312_v41  ;;  %v3173_v29 = vsub.f32 %v1021_v56, %v1082_v31  ;;  %v134_v53 = vsel %vm132_vm0, %v80_v62, 0  ;;  %4331 = vst [vmem:[#allocation55_spill] sm:$0xff] %v3179_v2  ;;  %v3185_v56 = vsub.f32 %v122_v42, %v194_v58  ;;  %v209_v28 = vand.u32 4294901760, %v127_v14  ;;  %v1027_v31 = vld [vmem:[#allocation8 + $0xb0] sm:$0xff] }
  0x6d   :  { %4320 = vst [vmem:[#allocation44_spill] sm:$0xff] %v3143_v21  ;;  %2304 = vmatprep.subr.bf16.mxu1 %v4312_v41  ;;  %4330 = vst [vmem:[#allocation54_spill] sm:$0xff] %v3175_v27  ;;  %v3181_v39 = vand.u32 4294901760, %v134_v53  ;;  %v3187_v22 = vpack.c.bf16 %v1091_v46, %v1088_v63  ;;  %v3190_v0 = vsub.f32 %v123_v54, %v197_v20  ;;  %v1100_v54 = vand.u32 4294901760, %v1027_v31 }
  0x6e   :  { %4329 = vst [vmem:[#allocation53_spill] sm:$0xff] %v3173_v29  ;;  %4333 = vst [vmem:[#allocation57_spill] sm:$0xff] %v3185_v56  ;;  %v3192_v62 = vsub.f32 %v1023_v30, %v1088_v63  ;;  %v3199_v29 = vsub.f32 %v1024_v51, %v1091_v46  ;;  %v3201_v42 = vpack.c.bf16 %v203_v36, %v200_v55  ;;  %v3212_v63 = vld [vmem:[#allocation7 + $0xc0] sm:$0xff] }
  0x6f   :  { %2054 = vmatpush1.bf16.msra.mxu0 %v3156_v61  ;;  %4332 = vst [vmem:[#allocation56_spill] sm:$0xff] %v3181_v39  ;;  %4334 = vst [vmem:[#allocation58_spill] sm:$0xff] %v3187_v22  ;;  %v1028_v61 = vld [vmem:[#allocation8 + $0xb8] sm:$0xff]  ;;  %v3195_v27 = vsub.f32 %v134_v53, %v3181_v39  ;;  %v3203_v58 = vsub.f32 %v124_v16, %v200_v55  ;;  %v3205_v56 = vsub.f32 %v125_v33, %v203_v36  ;;  %v3214_v53 = vld [vmem:[#allocation7 + $0xc8] sm:$0xff] }
  0x70   :  { %2306 = vmatpush1.bf16.msra.mxu1 %v3163_v37  ;;  %2055 = vmatprep.subr.bf16.mxu0 %v4312_v41  ;;  %v3197_v37 = vand.u32 4294901760, %v79_v52  ;;  %4337 = vst [vmem:[#allocation61_spill] sm:$0xff] %v3201_v42  ;;  %v3208_v20 = vpack.c.bf16 %v1097_v17, %v1094_v15  ;;  %v3210_v30 = vsub.f32 %v1025_v35, %v1094_v15  ;;  %v1103_v55 = vand.u32 4294901760, %v1028_v61  ;;  %v3227_v46 = vld [vmem:[#allocation8 + $0xc0] sm:$0xff]  ;;  %v3229_v35 = vld [vmem:[#allocation8 + $0xc8] sm:$0xff]  ;;  %v3243_v39 = vld [vmem:[#allocation7 + $0xd0] sm:$0xff] }
  0x71   :  { %2307 = vmatprep.subr.bf16.mxu1 %v4312_v41  ;;  %4335 = vst [vmem:[#allocation59_spill] sm:$0xff] %v3195_v27  ;;  %4338 = vst [vmem:[#allocation62_spill] sm:$0xff] %v3205_v56  ;;  %v3217_v51 = vand.u32 4294901760, %v3195_v27  ;;  %v3221_v16 = vsub.f32 %v1026_v57, %v1097_v17  ;;  %v3223_v33 = vpack.c.bf16 %v209_v28, %v206_v19  ;;  %v4348_v17 = vand.u32 4294901760, %v2981_v38 }
  0x72   :  { %4336 = vst [vmem:[#allocation60_spill] sm:$0xff] %v3197_v37  ;;  %4339 = vst [vmem:[#allocation63_spill] sm:$0xff] %v3208_v20  ;;  %v3225_v36 = vsub.f32 %v126_v34, %v206_v19  ;;  %v3256_v19 = vsub.f32 %v1027_v31, %v1100_v54  ;;  %v4355_v34 = vand.u32 4294901760, %v3229_v35 }
  0x73   :  { %2057 = vmatpush1.bf16.msra.mxu0 %v3179_v2  ;;  %4340 = vst [vmem:[#allocation64_spill] sm:$0xff] %v3210_v30  ;;  %4341 = vst [vmem:[#allocation65_spill] sm:$0xff] %v3217_v51  ;;  %v234_v15 = vsub.f32 %v3195_v27, %v3217_v51  ;;  %v3239_v2 = vsub.f32 %v127_v14, %v209_v28  ;;  %v3249_v27 = vld [vmem:[#allocation7 + $0xd8] sm:$0xff]  ;;  %v3254_v28 = vpack.c.bf16 %v1103_v55, %v1100_v54  ;;  %v3262_v51 = vld [vmem:[#allocation8 + $0xd0] sm:$0xff] }
  0x74   :  { %2309 = vmatpush1.bf16.msra.mxu1 %v3187_v22  ;;  %2058 = vmatprep.subr.bf16.mxu0 %v4312_v41  ;;  %4342 = vst [vmem:[#allocation66_spill] sm:$0xff] %v3223_v33  ;;  %4343 = vst [vmem:[#allocation67_spill] sm:$0xff] %v3225_v36  ;;  %v3235_v22 = vsub.f32 %v79_v52, %v3197_v37  ;;  %v266_v31 = vsub.f32 %v2981_v38, %v4348_v17  ;;  %v4349_v54 = vand.u32 4294901760, %v2996_v1 }
  0x75   :  { %2310 = vmatprep.subr.bf16.mxu1 %v4312_v41  ;;  %v235_v57 = vand.u32 4294901760, %v234_v15  ;;  %4345 = vst [vmem:[#allocation69_spill] sm:$0xff] %v3254_v28  ;;  %4346 = vst [vmem:[#allocation70_spill] sm:$0xff] %v3256_v19  ;;  %v3264_v15 = vld [vmem:[#allocation8 + $0xd8] sm:$0xff]  ;;  %v4350_v52 = vand.u32 4294901760, %v3001_v4  ;;  %v3282_v19 = vsub.f32 %v1028_v61, %v1103_v55  ;;  %v4351_v17 = vand.u32 4294901760, %v3212_v63 }
  0x76   :  { %4344 = vst [vmem:[#allocation68_spill] sm:$0xff] %v3235_v22  ;;  %v3267_v14 = vand.u32 4294901760, %v3235_v22  ;;  %v273_v36 = vsub.f32 %v2996_v1, %v4349_v54  ;;  %v4352_v38 = vand.u32 4294901760, %v3214_v53  ;;  %v4360_v61 = vand.u32 4294901760, %v3243_v39 }
  0x77   :  { %2060 = vmatpush1.bf16.msra.mxu0 %v3201_v42  ;;  %236 = vmatprep.mubr.f32.mxu0 %v235_v57  ;;  %v4359_v42 = vand.u32 4294901760, %v3021_v3  ;;  %v4361_v55 = vand.u32 4294901760, %v3249_v27 }
  0x78   :  { %2312 = vmatpush1.bf16.msra.mxu1 %v3208_v20  ;;  %2061 = vmatprep.subr.bf16.mxu0 %v4312_v41  ;;  %4347 = vst [vmem:[#allocation71_spill] sm:$0xff] %v3267_v14  ;;  %v1160_v20 = vsub.f32 %v3001_v4, %v4350_v52  ;;  %v3288_v54 = vpack.c.bf16 %v4352_v38, %v4351_v17  ;;  %v4357_v52 = vand.u32 4294901760, %v3006_v60  ;;  %v4358_v38 = vand.u32 4294901760, %v3011_v59 }
  0x79   :  { %2313 = vmatprep.subr.bf16.mxu1 %v4312_v41  ;;  %1130 = vmatprep.mubr.f32.mxu1 %v235_v57  ;;  %v4354_v57 = vand.u32 4294901760, %v3227_v46 }
  0x7a   :  { %4353 = vst [vmem:[#allocation72_spill] sm:$0xff] %v3288_v54  ;;  %v1167_v37 = vsub.f32 %v3006_v60, %v4357_v52  ;;  %v280_v17 = vsub.f32 %v3011_v59, %v4358_v38  ;;  %v267_v52 = vand.u32 4294901760, %v266_v31  ;;  %v3317_v60 = vpack.c.bf16 %v4361_v55, %v4360_v61 }
  0x7b   :  { %2063 = vmatpush1.bf16.msra.mxu0 %v3223_v33  ;;  %v3294_v1 = vpack.c.bf16 %v4355_v34, %v4354_v57  ;;  %v287_v34 = vsub.f32 %v3021_v3, %v4359_v42  ;;  %v240_v57 = vsub.f32 %v3235_v22, %v3267_v14  ;;  %v1161_v38 = vand.u32 4294901760, %v1160_v20 }
  0x7c   :  { %2315 = vmatpush1.bf16.msra.mxu1 %v3254_v28  ;;  %2064 = vmatprep.subr.bf16.mxu0 %v4312_v41  ;;  %v274_v28 = vand.u32 4294901760, %v273_v36  ;;  %4362 = vst [vmem:[#allocation74_spill] sm:$0xff] %v3317_v60  ;;  %v4363_v59 = vand.u32 4294901760, %v3026_v5  ;;  %v4364_v3 = vand.u32 4294901760, %v3031_v6  ;;  %v1168_v36 = vand.u32 4294901760, %v1167_v37 }
  0x7d   :  { %4356 = vst [vmem:[#allocation73_spill] sm:$0xff] %v3294_v1  ;;  %2316 = vmatprep.subr.bf16.mxu1 %v4312_v41  ;;  %v4366_v20 = vand.u32 4294901760, %v3264_v15  ;;  %v281_v55 = vand.u32 4294901760, %v280_v17  ;;  %v4212_v14 = vand.u32 4294901760, %v3069_v24  ;;  %v241_v33 = vand.u32 4294901760, %v240_v57 }
  0x7e   :  { %v1174_v42 = vsub.f32 %v3026_v5, %v4363_v59  ;;  %v1181_v4 = vsub.f32 %v3031_v6, %v4364_v3  ;;  %v4365_v59 = vand.u32 4294901760, %v3262_v51  ;;  %v2071_v31 = vpack.c.bf16 %v274_v28, %v267_v52 }
  0x7f   :  { %2066 = vmatpush1.bf16.msra.mxu0 %v3288_v54  ;;  %v288_v61 = vand.u32 4294901760, %v287_v34  ;;  %v2323_v17 = vpack.c.bf16 %v1168_v36, %v1161_v38  ;;  %v4370_v28 = vand.u32 4294901760, %v3053_v12  ;;  %v4371_v57 = vand.u32 4294901760, %v3064_v23 }
  0x80   :  { %2318 = vmatpush1.bf16.msra.mxu1 %v3294_v1  ;;  %2067 = vmatprep.subr.bf16.mxu0 %v4312_v41  ;;  %v3336_v3 = vpack.c.bf16 %v4366_v20, %v4365_v59  ;;  %v4368_v1 = vand.u32 4294901760, %v3036_v7  ;;  %v1175_v22 = vand.u32 4294901760, %v1174_v42  ;;  %v1182_v6 = vand.u32 4294901760, %v1181_v4 }
  0x81   :  { %2319 = vmatprep.subr.bf16.mxu1 %v4312_v41  ;;  %v4369_v20 = vand.u32 4294901760, %v3041_v8  ;;  %v1188_v34 = vsub.f32 %v3053_v12, %v4370_v28  ;;  %v308_v4 = vsub.f32 %v3069_v24, %v4212_v14  ;;  %v4372_v52 = vand.u32 4294901760, %v3074_v26 }
  0x82   :  { %4367 = vst [vmem:[#allocation75_spill] sm:$0xff] %v3336_v3  ;;  %v294_v54 = vsub.f32 %v3036_v7, %v4368_v1  ;;  %v1195_v1 = vsub.f32 %v3064_v23, %v4371_v57  ;;  %v4375_v57 = vand.u32 4294901760, %v3214_v53  ;;  %v2074_v14 = vpack.c.bf16 %v288_v61, %v281_v55 }
  0x83   :  { %2069 = vmatpush1.bf16.msra.mxu0 %v3317_v60  ;;  %v301_v37 = vsub.f32 %v3041_v8, %v4369_v20  ;;  %v315_v38 = vsub.f32 %v3074_v26, %v4372_v52  ;;  %v4373_v20 = vand.u32 4294901760, %v3212_v63  ;;  %v2326_v52 = vpack.c.bf16 %v1182_v6, %v1175_v22  ;;  %v82_v60 = vld [vmem:[#allocation2 + $0x18] sm:$0xff] }
  0x84   :  { %2321 = vmatpush1.bf16.msra.mxu1 %v3336_v3  ;;  %2070 = vmatprep.subr.bf16.mxu0 %v4312_v41  ;;  %v3374_v59 = vsub.f32 %v3214_v53, %v4375_v57  ;;  %v295_v5 = vand.u32 4294901760, %v294_v54  ;;  %v4377_v42 = vand.u32 4294901760, %v3079_v48  ;;  %v4378_v3 = vand.u32 4294901760, %v3085_v49 }
  0x85   :  { %v3369_v28 = vsub.f32 %v3212_v63, %v4373_v20  ;;  %2322 = vmatprep.subr.bf16.mxu1 %v4312_v41  ;;  %v4220_v20 = vand.u32 4294901760, %v3100_v45  ;;  %v302_v53 = vand.u32 4294901760, %v301_v37  ;;  %v1189_v57 = vand.u32 4294901760, %v1188_v34 }
  0x86   :  { %4376 = vst [vmem:[#allocation77_spill] sm:$0xff] %v3374_v59  ;;  %242 = vmatmul.mubr.f32.vlgmr.msra.gmra.mrb[0].mxu0 %v241_v33  ;;  %v1202_v36 = vsub.f32 %v3079_v48, %v4377_v42  ;;  %v1209_v63 = vsub.f32 %v3085_v49, %v4378_v3  ;;  %v1196_v26 = vand.u32 4294901760, %v1195_v1  ;;  %v4219_v54 = vand.u32 4294901760, %v3105_v32 }
  0x87   :  { %4374 = vst [vmem:[#allocation76_spill] sm:$0xff] %v3369_v28  ;;  %2072 = vmatpush1.bf16.msra.mxu0 %v2071_v31  ;;  %1136 = vmatmul.mubr.f32.vlgmr.msra.gmra.mrb[0].mxu1 %v241_v33  ;;  %v309_v6 = vand.u32 4294901760, %v308_v4  ;;  %v316_v22 = vand.u32 4294901760, %v315_v38  ;;  %v4379_v61 = vand.u32 4294901760, %v3090_v18  ;;  %v4380_v3 = vand.u32 4294901760, %v3095_v25 }
  0x88   :  { %2324 = vmatpush1.bf16.msra.mxu1 %v2323_v17  ;;  %2073 = vmatprep.subr.bf16.mxu0 %v4312_v41  ;;  %v4381_v33 = vand.u32 4294901760, %v3227_v46  ;;  %v4383_v37 = vand.u32 4294901760, %v3229_v35  ;;  %v4221_v34 = vand.u32 4294901760, %v3113_v40  ;;  %v101_v4 = vsel %vm93_vm1, %v82_v60, -16384.0 }
  0x89   :  { %v322_v55 = vsub.f32 %v3090_v18, %v4379_v61  ;;  %v329_v42 = vsub.f32 %v3095_v25, %v4380_v3  ;;  %2325 = vmatprep.subr.bf16.mxu1 %v4312_v41  ;;  %v1203_v38 = vand.u32 4294901760, %v1202_v36  ;;  %v1210_v61 = vand.u32 4294901760, %v1209_v63  ;;  %v4388_v63 = vld [vmem:[#allocation46_spill] sm:$0xff] }
  0x8a   :  { %v3395_v31 = vsub.f32 %v3227_v46, %v4381_v33  ;;  %v3400_v17 = vsub.f32 %v3229_v35, %v4383_v37  ;;  %v1216_v46 = vsub.f32 %v3100_v45, %v4220_v20  ;;  %v2077_v3 = vpack.c.bf16 %v302_v53, %v295_v5  ;;  %v4386_v53 = vld [vmem:[#allocation43_spill] sm:$0xff] }
  0x8b   :  { %2075 = vmatpush1.bf16.msra.mxu0 %v2074_v14  ;;  %v2329_v33 = vpack.c.bf16 %v1196_v26, %v1189_v57  ;;  %v1223_v35 = vsub.f32 %v3105_v32, %v4219_v54  ;;  %v4226_v37 = vand.u32 4294901760, %v3127_v50  ;;  %v2080_v1 = vpack.c.bf16 %v316_v22, %v309_v6  ;;  %v4389_v32 = vld [vmem:[#allocation47_spill] sm:$0xff] }
  0x8c   :  { %4382 = vst [vmem:[#allocation78_spill] sm:$0xff] %v3395_v31  ;;  %4384 = vst [vmem:[#allocation79_spill] sm:$0xff] %v3400_v17  ;;  %2327 = vmatpush1.bf16.msra.mxu1 %v2326_v52  ;;  %2076 = vmatprep.subr.bf16.mxu0 %v4312_v41  ;;  %v323_v60 = vand.u32 4294901760, %v322_v55  ;;  %v330_v36 = vand.u32 4294901760, %v329_v42  ;;  %v336_v5 = vsub.f32 %v3113_v40, %v4221_v34  ;;  %v4385_v26 = vand.u32 4294901760, %v3122_v47  ;;  %v4387_v55 = vld [vmem:[#allocation45_spill] sm:$0xff] }
  0x8d   :  { %2328 = vmatprep.subr.bf16.mxu1 %v4312_v41  ;;  %v4227_v57 = vand.u32 4294901760, %v4386_v53  ;;  %v2332_v54 = vpack.c.bf16 %v1210_v61, %v1203_v38  ;;  %v1217_v6 = vand.u32 4294901760, %v1216_v46  ;;  %v4231_v22 = vand.u32 4294901760, %v3146_v43  ;;  %v4391_v46 = vld [vmem:[#allocation49_spill] sm:$0xff] }
  0x8e   :  { %v343_v14 = vsub.f32 %v3122_v47, %v4385_v26  ;;  %v1224_v20 = vand.u32 4294901760, %v1223_v35  ;;  %v1230_v34 = vsub.f32 %v3127_v50, %v4226_v37  ;;  %v2083_v52 = vpack.c.bf16 %v330_v36, %v323_v60 }
  0x8f   :  { %2078 = vmatpush1.bf16.msra.mxu0 %v2077_v3  ;;  %v4390_v38 = vand.u32 4294901760, %v3132_v13  ;;  %v337_v35 = vand.u32 4294901760, %v336_v5  ;;  %v350_v26 = vsub.f32 %v4386_v53, %v4227_v57  ;;  %v1244_v36 = vsub.f32 %v3146_v43, %v4231_v22 }
  0x90   :  { %2330 = vmatpush1.bf16.msra.mxu1 %v2329_v33  ;;  %2079 = vmatprep.subr.bf16.mxu0 %v4312_v41  ;;  %v344_v37 = vand.u32 4294901760, %v343_v14  ;;  %v4392_v33 = vand.u32 4294901760, %v3143_v21  ;;  %v2335_v14 = vpack.c.bf16 %v1224_v20, %v1217_v6  ;;  %v1231_v40 = vand.u32 4294901760, %v1230_v34  ;;  %v4398_v34 = vld [vmem:[#allocation53_spill] sm:$0xff] }
  0x91   :  { %v1237_v61 = vsub.f32 %v3132_v13, %v4390_v38  ;;  %2331 = vmatprep.subr.bf16.mxu1 %v4312_v41  ;;  %v4393_v38 = vand.u32 4294901760, %v4387_v55  ;;  %v4394_v57 = vand.u32 4294901760, %v4388_v63 }
  0x92   :  { %v357_v60 = vsub.f32 %v3143_v21, %v4392_v33  ;;  %v4395_v33 = vand.u32 4294901760, %v4389_v32 }
  0x93   :  { %v1251_v3 = vsub.f32 %v4387_v55, %v4393_v38  ;;  %2081 = vmatpush1.bf16.msra.mxu0 %v2080_v1  ;;  %v364_v53 = vsub.f32 %v4388_v63, %v4394_v57  ;;  %v1238_v22 = vand.u32 4294901760, %v1237_v61  ;;  %v4396_v38 = vand.u32 4294901760, %v4391_v46  ;;  %v4402_v55 = vld [vmem:[#allocation54_spill] sm:$0xff] }
  0x94   :  { %v371_v21 = vsub.f32 %v4389_v32, %v4395_v33  ;;  %2333 = vmatpush1.bf16.msra.mxu1 %v2332_v54  ;;  %2082 = vmatprep.subr.bf16.mxu0 %v4312_v41  ;;  %v4397_v1 = vand.u32 4294901760, %v3166_v10  ;;  %v4399_v57 = vand.u32 4294901760, %v3243_v39  ;;  %v137_v54 = vsel %vm132_vm0, %v101_v4, 0 }
  0x95   :  { %v1258_v42 = vsub.f32 %v4391_v46, %v4396_v38  ;;  %2334 = vmatprep.subr.bf16.mxu1 %v4312_v41  ;;  %v351_v61 = vand.u32 4294901760, %v350_v26  ;;  %v358_v33 = vand.u32 4294901760, %v357_v60  ;;  %v1245_v32 = vand.u32 4294901760, %v1244_v36 }
  0x96   :  { %v1265_v20 = vsub.f32 %v3166_v10, %v4397_v1  ;;  %v3470_v5 = vsub.f32 %v3243_v39, %v4399_v57  ;;  %v1252_v63 = vand.u32 4294901760, %v1251_v3  ;;  %v4400_v38 = vand.u32 4294901760, %v3169_v11 }
  0x97   :  { %v4401_v1 = vand.u32 4294901760, %v3171_v9  ;;  %2084 = vmatpush1.bf16.msra.mxu0 %v2083_v52  ;;  %v2086_v10 = vpack.c.bf16 %v344_v37, %v337_v35  ;;  %v365_v39 = vand.u32 4294901760, %v364_v53  ;;  %v372_v57 = vand.u32 4294901760, %v371_v21  ;;  %v4405_v53 = vld [vmem:[#allocation57_spill] sm:$0xff] }
  0x98   :  { %v378_v46 = vsub.f32 %v3169_v11, %v4400_v38  ;;  %v4246_v4 = vand.u32 4294901760, %v4402_v55  ;;  %2336 = vmatpush1.bf16.msra.mxu1 %v2335_v14  ;;  %2085 = vmatprep.subr.bf16.mxu0 %v4312_v41  ;;  %v2338_v26 = vpack.c.bf16 %v1238_v22, %v1231_v40  ;;  %v1259_v60 = vand.u32 4294901760, %v1258_v42  ;;  %v81_v14 = vld [vmem:[#allocation2 + $0x10] sm:$0xff] }
  0x99   :  { %v385_v6 = vsub.f32 %v3171_v9, %v4401_v1  ;;  %v1266_v3 = vand.u32 4294901760, %v1265_v20  ;;  %v4403_v36 = vand.u32 4294901760, %v4398_v34  ;;  %v4404_v11 = vand.u32 4294901760, %v3249_v27  ;;  %2337 = vmatprep.subr.bf16.mxu1 %v4312_v41 }
  0x9a   :  { %v3490_v37 = vand.u32 4294901760, %v137_v54  ;;  %v2089_v21 = vpack.c.bf16 %v358_v33, %v351_v61  ;;  %v4240_v52 = vand.u32 4294901760, %v4405_v53  ;;  %v2341_v35 = vpack.c.bf16 %v1252_v63, %v1245_v32 }
  0x9b   :  { %v1272_v38 = vsub.f32 %v4398_v34, %v4403_v36  ;;  %v3488_v1 = vsub.f32 %v3249_v27, %v4404_v11  ;;  %v379_v40 = vand.u32 4294901760, %v378_v46  ;;  %v386_v22 = vand.u32 4294901760, %v385_v6  ;;  %2087 = vmatpush1.bf16.msra.mxu0 %v2086_v10 }
  0x9c   :  { %v4244_v42 = vand.u32 4294901760, %v3190_v0  ;;  %v2092_v20 = vpack.c.bf16 %v372_v57, %v365_v39  ;;  %v1279_v27 = vsub.f32 %v4402_v55, %v4246_v4  ;;  %v4242_v11 = vand.u32 4294901760, %v3192_v62  ;;  %2339 = vmatpush1.bf16.msra.mxu1 %v2338_v26  ;;  %2088 = vmatprep.subr.bf16.mxu0 %v4312_v41 }
  0x9d   :  { %v4241_v36 = vand.u32 4294901760, %v3199_v29  ;;  %v2344_v61 = vpack.c.bf16 %v1266_v3, %v1259_v60  ;;  %v1273_v32 = vand.u32 4294901760, %v1272_v38  ;;  %v4243_v63 = vand.u32 4294901760, %v3203_v58  ;;  %2340 = vmatprep.subr.bf16.mxu1 %v4312_v41 }
  0x9e   :  { %v4245_v46 = vand.u32 4294901760, %v3205_v56  ;;  %v392_v10 = vsub.f32 %v4405_v53, %v4240_v52  ;;  %v4250_v6 = vand.u32 4294901760, %v3210_v30  ;;  %v3509_v33 = vsub.f32 %v137_v54, %v3490_v37 }
  0x9f   :  { %v100_v39 = vsel %vm93_vm1, %v81_v14, -16384.0  ;;  %v2095_v57 = vpack.c.bf16 %v386_v22, %v379_v40  ;;  %v399_v26 = vsub.f32 %v3190_v0, %v4244_v42  ;;  %v4255_v60 = vand.u32 4294901760, %v3221_v16  ;;  %2090 = vmatpush1.bf16.msra.mxu0 %v2089_v21 }
  0xa0   :  { %4406 = vst [vmem:[#allocation53_spill] sm:$0xff] %v3509_v33  ;;  %v3517_v3 = vand.u32 4294901760, %v100_v39  ;;  %v1280_v38 = vand.u32 4294901760, %v1279_v27  ;;  %v1286_v52 = vsub.f32 %v3192_v62, %v4242_v11  ;;  %v1293_v54 = vsub.f32 %v3199_v29, %v4241_v36  ;;  %2342 = vmatpush1.bf16.msra.mxu1 %v2341_v35  ;;  %2091 = vmatprep.subr.bf16.mxu0 %v4312_v41  ;;  %v4409_v35 = vld [vmem:[#allocation67_spill] sm:$0xff] }
  0xa1   :  { %v3526_v40 = vand.u32 4294901760, %v3509_v33  ;;  %v406_v22 = vsub.f32 %v3203_v58, %v4243_v63  ;;  %v413_v21 = vsub.f32 %v3205_v56, %v4245_v46  ;;  %2343 = vmatprep.subr.bf16.mxu1 %v4312_v41  ;;  %v1300_v27 = vsub.f32 %v3210_v30, %v4250_v6 }
  0xa2   :  { %v3536_v14 = vsub.f32 %v100_v39, %v3517_v3  ;;  %v393_v42 = vand.u32 4294901760, %v392_v10  ;;  %v1307_v46 = vsub.f32 %v3221_v16, %v4255_v60  ;;  %v4410_v39 = vld [vmem:[#allocation70_spill] sm:$0xff]  ;;  %v2347_v56 = vpack.c.bf16 %v1280_v38, %v1273_v32 }
  0xa3   :  { %4407 = vst [vmem:[#allocation54_spill] sm:$0xff] %v3526_v40  ;;  %v249_v63 = vsub.f32 %v3509_v33, %v3526_v40  ;;  %2093 = vmatpush1.bf16.msra.mxu0 %v2092_v20  ;;  %v400_v6 = vand.u32 4294901760, %v399_v26  ;;  %v4260_v36 = vand.u32 4294901760, %v3282_v19  ;;  %v1287_v11 = vand.u32 4294901760, %v1286_v52 }
  0xa4   :  { %4408 = vst [vmem:[#allocation57_spill] sm:$0xff] %v3536_v14  ;;  %v3551_v44 = vand.u32 4294901760, %v3536_v14  ;;  %2345 = vmatpush1.bf16.msra.mxu1 %v2344_v61  ;;  %2094 = vmatprep.subr.bf16.mxu0 %v4312_v41  ;;  %v1294_v10 = vand.u32 4294901760, %v1293_v54  ;;  %v407_v40 = vand.u32 4294901760, %v406_v22  ;;  %v414_v4 = vand.u32 4294901760, %v413_v21 }
  0xa5   :  { %v250_v30 = vand.u32 4294901760, %v249_v63  ;;  %2346 = vmatprep.subr.bf16.mxu1 %v4312_v41  ;;  %v1301_v33 = vand.u32 4294901760, %v1300_v27  ;;  %v4412_v20 = vand.u32 4294901760, %v4409_v35  ;;  %v4413_v26 = vand.u32 4294901760, %v3239_v2 }
  0xa6   :  { %4411 = vst [vmem:[#allocation67_spill] sm:$0xff] %v3551_v44  ;;  %v255_v60 = vsub.f32 %v3536_v14, %v3551_v44  ;;  %v1308_v63 = vand.u32 4294901760, %v1307_v46  ;;  %v4414_v52 = vand.u32 4294901760, %v4410_v39  ;;  %v4262_v54 = vand.u32 4294901760, %v3369_v28 }
  0xa7   :  { %v420_v32 = vsub.f32 %v4409_v35, %v4412_v20  ;;  %v427_v61 = vsub.f32 %v3239_v2, %v4413_v26  ;;  %251 = vmatprep.mubr.f32.mxu0 %v250_v30  ;;  %1145 = vmatprep.mubr.f32.mxu1 %v250_v30  ;;  %v4415_v21 = vand.u32 4294901760, %v3262_v51  ;;  %v2098_v20 = vpack.c.bf16 %v400_v6, %v393_v42 }
  0xa8   :  { %v1314_v38 = vsub.f32 %v4410_v39, %v4414_v52  ;;  %v256_v22 = vand.u32 4294901760, %v255_v60  ;;  %2096 = vmatpush1.bf16.msra.mxu0 %v2095_v57  ;;  %v1321_v26 = vsub.f32 %v3282_v19, %v4260_v36  ;;  %v4261_v46 = vand.u32 4294901760, %v3374_v59  ;;  %2348 = vmatpush1.bf16.msra.mxu1 %v2347_v56  ;;  %v4417_v56 = vld [vmem:[#allocation56_spill] sm:$0xff] }
  0xa9   :  { %v3571_v27 = vsub.f32 %v3262_v51, %v4415_v21  ;;  %v4416_v44 = vand.u32 4294901760, %v3264_v15  ;;  %2097 = vmatprep.subr.bf16.mxu0 %v4312_v41  ;;  %v2350_v30 = vpack.c.bf16 %v1294_v10, %v1287_v11  ;;  %v4263_v51 = vand.u32 4294901760, %v3395_v31  ;;  %2349 = vmatprep.subr.bf16.mxu1 %v4312_v41 }
  0xaa   :  { %v4265_v57 = vand.u32 4294901760, %v3400_v17  ;;  %v2101_v42 = vpack.c.bf16 %v414_v4, %v407_v40  ;;  %v421_v6 = vand.u32 4294901760, %v420_v32  ;;  %257 = vmatmul.mubr.f32.gmra.mrb[2].mxu0 %v256_v22  ;;  %v2353_v60 = vpack.c.bf16 %v1308_v63, %v1301_v33  ;;  %1151 = vmatmul.mubr.f32.gmra.mrb[2].mxu1 %v256_v22  ;;  %v4418_v22 = vld [vmem:[#allocation27_spill] sm:$0xff] }
  0xab   :  { %v3580_v52 = vsub.f32 %v3264_v15, %v4416_v44  ;;  %v428_v21 = vand.u32 4294901760, %v427_v61  ;;  %v1315_v36 = vand.u32 4294901760, %v1314_v38  ;;  %v434_v44 = vsub.f32 %v3369_v28, %v4262_v54  ;;  %467 = vmatprep.mubr.f32.mxu0 %v4417_v56  ;;  %1361 = vmatprep.mubr.f32.mxu1 %v4417_v56  ;;  %v4423_v54 = vld [vmem:[#allocation30_spill] sm:$0xff]  ;;  %v4425_v40 = vld [vmem:[#allocation31_spill] sm:$0xff] }
  0xac   :  { %2099 = vmatpush1.bf16.msra.mxu0 %v2098_v20  ;;  %v1322_v15 = vand.u32 4294901760, %v1321_v26  ;;  %v441_v11 = vsub.f32 %v3374_v59, %v4261_v46  ;;  %2351 = vmatpush1.bf16.msra.mxu1 %v2350_v30  ;;  %v1328_v33 = vsub.f32 %v3395_v31, %v4263_v51  ;;  %v1335_v10 = vsub.f32 %v3400_v17, %v4265_v57  ;;  %v4420_v26 = vld [vmem:[#allocation29_spill] sm:$0xff] }
  0xad   :  { %2100 = vmatprep.subr.bf16.mxu0 %v4312_v41  ;;  %2352 = vmatprep.subr.bf16.mxu1 %v4312_v41  ;;  %v2104_v63 = vpack.c.bf16 %v428_v21, %v421_v6  ;;  %v435_v38 = vand.u32 4294901760, %v434_v44  ;;  %v4419_v20 = vand.u32 4294901760, %v4418_v22  ;;  %v4421_v30 = vand.u32 4294901760, %v4420_v26 }
  0xae   :  { %v4424_v51 = vand.u32 4294901760, %v4423_v54  ;;  %v4426_v4 = vand.u32 4294901760, %v4425_v40  ;;  %v2356_v57 = vpack.c.bf16 %v1322_v15, %v1315_v36  ;;  %v442_v32 = vand.u32 4294901760, %v441_v11  ;;  %v4432_v15 = vld [vmem:[#allocation32_spill] sm:$0xff] }
  0xaf   :  { %v3610_v46 = vpack.c.bf16 %v4421_v30, %v4419_v20  ;;  %v4428_v61 = vand.u32 4294901760, %v3470_v5  ;;  %v4429_v21 = vand.u32 4294901760, %v3488_v1  ;;  %v1329_v20 = vand.u32 4294901760, %v1328_v33  ;;  %v4439_v33 = vld [vmem:[#allocation35_spill] sm:$0xff] }
  0xb0   :  { %v3616_v56 = vpack.c.bf16 %v4426_v4, %v4424_v51  ;;  %2102 = vmatpush1.bf16.msra.mxu0 %v2101_v42  ;;  %2354 = vmatpush1.bf16.msra.mxu1 %v2353_v60  ;;  %v1336_v30 = vand.u32 4294901760, %v1335_v10  ;;  %v4431_v36 = vand.u32 4294901760, %v3580_v52  ;;  %v4433_v11 = vand.u32 4294901760, %v4432_v15  ;;  %v4434_v4 = vld [vmem:[#allocation33_spill] sm:$0xff]  ;;  %v4437_v60 = vld [vmem:[#allocation34_spill] sm:$0xff] }
  0xb1   :  { %4422 = vst [vmem:[#allocation70_spill] sm:$0xff] %v3610_v46  ;;  %v448_v6 = vsub.f32 %v3470_v5, %v4428_v61  ;;  %v455_v44 = vsub.f32 %v3488_v1, %v4429_v21  ;;  %2103 = vmatprep.subr.bf16.mxu0 %v4312_v41  ;;  %v4430_v46 = vand.u32 4294901760, %v3571_v27  ;;  %2355 = vmatprep.subr.bf16.mxu1 %v4312_v41  ;;  %v4435_v61 = vand.u32 4294901760, %v4434_v4 }
  0xb2   :  { %4427 = vst [vmem:[#allocation27_spill] sm:$0xff] %v3616_v56  ;;  %v1349_v42 = vsub.f32 %v3580_v52, %v4431_v36  ;;  %v4438_v56 = vand.u32 4294901760, %v4437_v60  ;;  %v4440_v10 = vand.u32 4294901760, %v4439_v33  ;;  %v2359_v36 = vpack.c.bf16 %v1336_v30, %v1329_v20 }
  0xb3   :  { %v1342_v51 = vsub.f32 %v3571_v27, %v4430_v46  ;;  %v3636_v21 = vpack.c.bf16 %v4435_v61, %v4433_v11  ;;  %v2107_v46 = vpack.c.bf16 %v442_v32, %v435_v38  ;;  %v449_v17 = vand.u32 4294901760, %v448_v6 }
  0xb4   :  { %v3642_v14 = vpack.c.bf16 %v4440_v10, %v4438_v56  ;;  %2105 = vmatpush1.bf16.msra.mxu0 %v2104_v63  ;;  %v456_v31 = vand.u32 4294901760, %v455_v44  ;;  %2357 = vmatpush1.bf16.msra.mxu1 %v2356_v57  ;;  %v1350_v28 = vand.u32 4294901760, %v1349_v42  ;;  %v4441_v11 = vand.u32 4294901760, %v3036_v7  ;;  %v4446_v44 = vld [vmem:[#allocation38_spill] sm:$0xff] }
  0xb5   :  { %4436 = vst [vmem:[#allocation29_spill] sm:$0xff] %v3636_v21  ;;  %2106 = vmatprep.subr.bf16.mxu0 %v4312_v41  ;;  %v1343_v59 = vand.u32 4294901760, %v1342_v51  ;;  %2358 = vmatprep.subr.bf16.mxu1 %v4312_v41  ;;  %v4442_v61 = vand.u32 4294901760, %v3041_v8  ;;  %v4443_v56 = vand.u32 4294901760, %v3053_v12  ;;  %v4444_v32 = vand.u32 4294901760, %v3064_v23 }
  0xb6   :  { %v2110_v57 = vpack.c.bf16 %v456_v31, %v449_v17  ;;  %v4445_v6 = vand.u32 4294901760, %v3069_v24  ;;  %v4447_v20 = vand.u32 4294901760, %v4446_v44  ;;  %v4448_v51 = vand.u32 4294901760, %v3079_v48 }
  0xb7   :  { %v3650_v21 = vpack.c.bf16 %v4442_v61, %v4441_v11  ;;  %v3656_v63 = vpack.c.bf16 %v4444_v32, %v4443_v56  ;;  %v2362_v38 = vpack.c.bf16 %v1350_v28, %v1343_v59  ;;  %v4449_v42 = vand.u32 4294901760, %v3085_v49  ;;  %v4454_v61 = vld [vmem:[#allocation39_spill] sm:$0xff]  ;;  %v4456_v56 = vld [vmem:[#allocation41_spill] sm:$0xff] }
  0xb8   :  { %2108 = vmatpush1.bf16.msra.mxu0 %v2107_v46  ;;  %2360 = vmatpush1.bf16.msra.mxu1 %v2359_v36  ;;  %v3664_v30 = vpack.c.bf16 %v4447_v20, %v4445_v6  ;;  %v2113_v31 = vpack.c.bf16 %v4420_v26, %v4418_v22  ;;  %v2365_v59 = vpack.c.bf16 %v4425_v40, %v4423_v54  ;;  %v4450_v28 = vand.u32 4294901760, %v3090_v18  ;;  %v4452_v36 = vld [vmem:[#allocation60_spill] sm:$0xff]  ;;  %v4461_v20 = vld [vmem:[#allocation59_spill] sm:$0xff] }
  0xb9   :  { %2109 = vmatprep.subr.bf16.mxu0 %v4312_v41  ;;  %2361 = vmatprep.subr.bf16.mxu1 %v4312_v41  ;;  %v3670_v10 = vpack.c.bf16 %v4449_v42, %v4448_v51  ;;  %v4451_v17 = vand.u32 4294901760, %v3095_v25  ;;  %v4453_v11 = vand.u32 4294901760, %v3100_v45  ;;  %v4455_v22 = vand.u32 4294901760, %v4454_v61  ;;  %v4462_v51 = vld [vmem:[#allocation43_spill] sm:$0xff] }
  0xba   :  { %v2116_v54 = vpack.c.bf16 %v4434_v4, %v4432_v15  ;;  %v2368_v40 = vpack.c.bf16 %v4439_v33, %v4437_v60  ;;  %v4457_v32 = vand.u32 4294901760, %v4456_v56  ;;  %v4459_v15 = vand.u32 4294901760, %v3127_v50 }
  0xbb   :  { %v3682_v46 = vpack.c.bf16 %v4451_v17, %v4450_v28  ;;  %v3689_v26 = vpack.c.bf16 %v4455_v22, %v4453_v11  ;;  %v4460_v4 = vand.u32 4294901760, %v3132_v13  ;;  %v2119_v60 = vpack.c.bf16 %v3041_v8, %v3036_v7  ;;  %v4467_v8 = vld [vmem:[#allocation45_spill] sm:$0xff]  ;;  %v4469_v22 = vld [vmem:[#allocation46_spill] sm:$0xff] }
  0xbc   :  { %2111 = vmatpush1.bf16.msra.mxu0 %v2110_v57  ;;  %2363 = vmatpush1.bf16.msra.mxu1 %v2362_v38  ;;  %v4458_v57 = vand.u32 4294901760, %v3122_v47  ;;  %v2371_v33 = vpack.c.bf16 %v3064_v23, %v3053_v12  ;;  %v4463_v42 = vand.u32 4294901760, %v4462_v51  ;;  %v4466_v7 = vand.u32 4294901760, %v3146_v43 }
  0xbd   :  { %2112 = vmatprep.subr.bf16.mxu0 %v4312_v41  ;;  %2364 = vmatprep.subr.bf16.mxu1 %v4312_v41  ;;  %v3711_v6 = vpack.c.bf16 %v4460_v4, %v4459_v15  ;;  %v4468_v17 = vand.u32 4294901760, %v4467_v8  ;;  %v2122_v12 = vpack.c.bf16 %v4446_v44, %v3069_v24  ;;  %v2374_v23 = vpack.c.bf16 %v3085_v49, %v3079_v48  ;;  %v4473_v15 = vld [vmem:[#allocation49_spill] sm:$0xff]  ;;  %v4477_v49 = vld [vmem:[#allocation52_spill] sm:$0xff] }
  0xbe   :  { %v3703_v38 = vpack.c.bf16 %v4458_v57, %v4457_v32  ;;  %v4474_v4 = vand.u32 4294901760, %v4473_v15  ;;  %v2125_v24 = vpack.c.bf16 %v3095_v25, %v3090_v18  ;;  %v2377_v48 = vpack.c.bf16 %v4454_v61, %v3100_v45 }
  0xbf   :  { %469 = vmatmul.mubr.f32.vlgmr.msra.gmra.mrb[0].mxu0 %v4452_v36  ;;  %1363 = vmatmul.mubr.f32.vlgmr.msra.gmra.mrb[0].mxu1 %v4452_v36  ;;  %v3732_v11 = vpack.c.bf16 %v4468_v17, %v4466_v7  ;;  %v4478_v44 = vand.u32 4294901760, %v4477_v49  ;;  %v4480_v7 = vand.u32 4294901760, %v4398_v34  ;;  %v4481_v17 = vand.u32 4294901760, %v4402_v55 }
  0xc0   :  { %2114 = vmatpush1.bf16.msra.mxu0 %v2113_v31  ;;  %2366 = vmatpush1.bf16.msra.mxu1 %v2365_v59  ;;  %v4464_v31 = vld [vmem:[#allocation44_spill] sm:$0xff]  ;;  %v2128_v18 = vpack.c.bf16 %v3122_v47, %v4456_v56  ;;  %v2380_v25 = vpack.c.bf16 %v3132_v13, %v3127_v50  ;;  %v4482_v45 = vand.u32 4294901760, %v4405_v53  ;;  %v4483_v61 = vand.u32 4294901760, %v3190_v0  ;;  %v4487_v56 = vld [vmem:[#allocation62_spill] sm:$0xff] }
  0xc1   :  { %2115 = vmatprep.subr.bf16.mxu0 %v4312_v41  ;;  %2367 = vmatprep.subr.bf16.mxu1 %v4312_v41  ;;  %v4465_v59 = vand.u32 4294901760, %v4464_v31  ;;  %v2131_v47 = vpack.c.bf16 %v4464_v31, %v4462_v51  ;;  %v2383_v13 = vpack.c.bf16 %v4467_v8, %v3146_v43  ;;  %v4486_v50 = vand.u32 4294901760, %v3203_v58 }
  0xc2   :  { %474 = vmatprep.mubr.f32.mxu0 %v3490_v37  ;;  %1368 = vmatprep.mubr.f32.mxu1 %v3490_v37  ;;  %v2137_v31 = vpack.c.bf16 %v3171_v9, %v4477_v49  ;;  %v2389_v8 = vpack.c.bf16 %v4402_v55, %v4398_v34  ;;  %v4494_v55 = vand.u32 4294901760, %v3571_v27  ;;  %v4495_v34 = vand.u32 4294901760, %v3580_v52 }
  0xc3   :  { %476 = vmatmul.mubr.f32.gmra.mrb[2].mxu0 %v3517_v3  ;;  %1370 = vmatmul.mubr.f32.gmra.mrb[2].mxu1 %v3517_v3  ;;  %v3725_v28 = vpack.c.bf16 %v4465_v59, %v4463_v42 }
  0xc4   :  { %2117 = vmatpush1.bf16.msra.mxu0 %v2116_v54  ;;  %2369 = vmatpush1.bf16.msra.mxu1 %v2368_v40  ;;  %v4470_v54 = vand.u32 4294901760, %v4469_v22  ;;  %v4471_v40 = vld [vmem:[#allocation47_spill] sm:$0xff]  ;;  %v3834_v49 = vpack.c.bf16 %v4495_v34, %v4494_v55  ;;  %v4521_v55 = vld [vmem:[#allocation50_spill] sm:$0xff] }
  0xc5   :  { %2118 = vmatprep.subr.bf16.mxu0 %v4312_v41  ;;  %2370 = vmatprep.subr.bf16.mxu1 %v4312_v41  ;;  %v4472_v32 = vand.u32 4294901760, %v4471_v40  ;;  %v2134_v51 = vpack.c.bf16 %v4471_v40, %v4469_v22  ;;  %v2140_v22 = vpack.c.bf16 %v3190_v0, %v4405_v53  ;;  %v2392_v40 = vpack.c.bf16 %v3199_v29, %v3192_v62  ;;  %v4522_v34 = vld [vmem:[#allocation55_spill] sm:$0xff] }
  0xc6   :  { %603 = vmatprep.mubr.f32.mxu0 %v4461_v20  ;;  %1497 = vmatprep.mubr.f32.mxu1 %v4461_v20  ;;  %v2143_v0 = vpack.c.bf16 %v4487_v56, %v3203_v58  ;;  %v2398_v53 = vpack.c.bf16 %v3282_v19, %v4410_v39  ;;  %v4496_v58 = vld [vmem:[#allocation76_spill] sm:$0xff] }
  0xc7   :  { %v3744_v57 = vpack.c.bf16 %v4472_v32, %v4470_v54  ;;  %v4484_v54 = vand.u32 4294901760, %v3192_v62  ;;  %v4485_v32 = vand.u32 4294901760, %v3199_v29  ;;  %v2146_v62 = vpack.c.bf16 %v3239_v2, %v4409_v35 }
  0xc8   :  { %2120 = vmatpush1.bf16.msra.mxu0 %v2119_v60  ;;  %2372 = vmatpush1.bf16.msra.mxu1 %v2371_v33  ;;  %v4475_v60 = vld [vmem:[#allocation51_spill] sm:$0xff]  ;;  %v4479_v33 = vand.u32 4294901760, %v3171_v9  ;;  %v4492_v9 = vand.u32 4294901760, %v3470_v5 }
  0xc9   :  { %2121 = vmatprep.subr.bf16.mxu0 %v4312_v41  ;;  %2373 = vmatprep.subr.bf16.mxu1 %v4312_v41  ;;  %v4476_v20 = vand.u32 4294901760, %v4475_v60  ;;  %v2386_v43 = vpack.c.bf16 %v4475_v60, %v4473_v15  ;;  %v4493_v15 = vand.u32 4294901760, %v3488_v1 }
  0xca   :  { %v3762_v59 = vpack.c.bf16 %v4479_v33, %v4478_v44  ;;  %v4491_v33 = vand.u32 4294901760, %v3221_v16 }
  0xcb   :  { %v3750_v42 = vpack.c.bf16 %v4476_v20, %v4474_v4  ;;  %v3786_v4 = vpack.c.bf16 %v4485_v32, %v4484_v54  ;;  %v4488_v20 = vand.u32 4294901760, %v4487_v56  ;;  %v3828_v60 = vpack.c.bf16 %v4493_v15, %v4492_v9  ;;  %v4500_v32 = vld [vmem:[#allocation68_spill] sm:$0xff]  ;;  %v4508_v56 = vld [vmem:[#allocation19_spill] sm:$0xff]  ;;  %v4519_v9 = vld [vmem:[#allocation42_spill] sm:$0xff] }
  0xcc   :  { %2123 = vmatpush1.bf16.msra.mxu0 %v2122_v12  ;;  %2375 = vmatpush1.bf16.msra.mxu1 %v2374_v23  ;;  %v3768_v12 = vpack.c.bf16 %v4481_v17, %v4480_v7  ;;  %v3780_v23 = vpack.c.bf16 %v4483_v61, %v4482_v45  ;;  %v4497_v17 = vld [vmem:[#allocation77_spill] sm:$0xff]  ;;  %v2152_v61 = vpack.c.bf16 %v3488_v1, %v3470_v5  ;;  %v4502_v5 = vld [vmem:[#allocation16_spill] sm:$0xff] }
  0xcd   :  { %2124 = vmatprep.subr.bf16.mxu0 %v4312_v41  ;;  %2376 = vmatprep.subr.bf16.mxu1 %v4312_v41  ;;  %v2404_v54 = vpack.c.bf16 %v3580_v52, %v3571_v27  ;;  %v4503_v1 = vld [vmem:[#allocation53_spill] sm:$0xff]  ;;  %v4520_v15 = vld [vmem:[#allocation48_spill] sm:$0xff] }
  0xce   :  { %v4504_v27 = vld [vmem:[#allocation57_spill] sm:$0xff] }
  0xcf   :  { %v4505_v52 = vld [vmem:[#allocation17_spill] sm:$0xff] }
  0xd0   :  { %2126 = vmatpush1.bf16.msra.mxu0 %v2125_v24  ;;  %2378 = vmatpush1.bf16.msra.mxu1 %v2377_v48  ;;  %v3798_v24 = vpack.c.bf16 %v4488_v20, %v4486_v50  ;;  %v4489_v48 = vld [vmem:[#allocation64_spill] sm:$0xff]  ;;  %v4507_v50 = vld [vmem:[#allocation65_spill] sm:$0xff] }
  0xd1   :  { %2127 = vmatprep.subr.bf16.mxu0 %v4312_v41  ;;  %2379 = vmatprep.subr.bf16.mxu1 %v4312_v41  ;;  %v4490_v44 = vand.u32 4294901760, %v4489_v48  ;;  %v2395_v29 = vpack.c.bf16 %v3221_v16, %v4489_v48  ;;  %v4498_v16 = vld [vmem:[#allocation78_spill] sm:$0xff]  ;;  %v4509_v20 = vld [vmem:[#allocation20_spill] sm:$0xff]  ;;  %v4510_v48 = vld [vmem:[#allocation21_spill] sm:$0xff] }
  0xd3   :  { %v3804_v7 = vpack.c.bf16 %v4491_v33, %v4490_v44  ;;  %v4511_v44 = vld [vmem:[#allocation22_spill] sm:$0xff]  ;;  %v4512_v33 = vld [vmem:[#allocation23_spill] sm:$0xff] }
  0xd4   :  { %2129 = vmatpush1.bf16.msra.mxu0 %v2128_v18  ;;  %2381 = vmatpush1.bf16.msra.mxu1 %v2380_v25  ;;  %v2149_v18 = vpack.c.bf16 %v4497_v17, %v4496_v58  ;;  %v4499_v25 = vld [vmem:[#allocation79_spill] sm:$0xff] }
  0xd5   :  { %2130 = vmatprep.subr.bf16.mxu0 %v4312_v41  ;;  %2382 = vmatprep.subr.bf16.mxu1 %v4312_v41  ;;  %v2401_v45 = vpack.c.bf16 %v4499_v25, %v4498_v16 }
  0xd8   :  { %2132 = vmatpush1.bf16.msra.mxu0 %v2131_v47  ;;  %2384 = vmatpush1.bf16.msra.mxu1 %v2383_v13  ;;  %v4501_v47 = vld [vmem:[#allocation15_spill] sm:$0xff]  ;;  %v4506_v13 = vld [vmem:[#allocation18_spill] sm:$0xff] }
  0xd9   :  { %2133 = vmatprep.subr.bf16.mxu0 %v4312_v41  ;;  %2385 = vmatprep.subr.bf16.mxu1 %v4312_v41 }
  0xdc   :  { %2135 = vmatpush1.bf16.msra.mxu0 %v2134_v51  ;;  %2387 = vmatpush1.bf16.msra.mxu1 %v2386_v43  ;;  %v4513_v51 = vld [vmem:[#allocation24_spill] sm:$0xff]  ;;  %v4514_v43 = vld [vmem:[#allocation25_spill] sm:$0xff] }
  0xdd   :  { %2136 = vmatprep.subr.bf16.mxu0 %v4312_v41  ;;  %2388 = vmatprep.subr.bf16.mxu1 %v4312_v41 }
  0xe0   :  { %2138 = vmatpush1.bf16.msra.mxu0 %v2137_v31  ;;  %2390 = vmatpush1.bf16.msra.mxu1 %v2389_v8  ;;  %v4515_v31 = vld [vmem:[#allocation28_spill] sm:$0xff] }
  0xe1   :  { %2139 = vmatprep.subr.bf16.mxu0 %v4312_v41  ;;  %2391 = vmatprep.subr.bf16.mxu1 %v4312_v41  ;;  %v4516_v8 = vld [vmem:[#allocation36_spill] sm:$0xff] }
  0xe4   :  { %2141 = vmatpush1.bf16.msra.mxu0 %v2140_v22  ;;  %2393 = vmatpush1.bf16.msra.mxu1 %v2392_v40  ;;  %v4517_v22 = vld [vmem:[#allocation37_spill] sm:$0xff]  ;;  %v4518_v40 = vld [vmem:[#allocation40_spill] sm:$0xff] }
  0xe5   :  { %2142 = vmatprep.subr.bf16.mxu0 %v4312_v41  ;;  %2394 = vmatprep.subr.bf16.mxu1 %v4312_v41 }
  0xe8   :  { %2144 = vmatpush1.bf16.msra.mxu0 %v2143_v0  ;;  %2396 = vmatpush1.bf16.msra.mxu1 %v2395_v29  ;;  %v4523_v0 = vld [vmem:[#allocation58_spill] sm:$0xff]  ;;  %v4524_v29 = vld [vmem:[#allocation61_spill] sm:$0xff] }
  0xe9   :  { %2145 = vmatprep.subr.bf16.mxu0 %v4312_v41  ;;  %2397 = vmatprep.subr.bf16.mxu1 %v4312_v41 }
  0xec   :  { %2147 = vmatpush1.bf16.msra.mxu0 %v2146_v62  ;;  %2399 = vmatpush1.bf16.msra.mxu1 %v2398_v53  ;;  %v4525_v62 = vld [vmem:[#allocation63_spill] sm:$0xff]  ;;  %v4526_v53 = vld [vmem:[#allocation66_spill] sm:$0xff] }
  0xed   :  { %2148 = vmatprep.subr.bf16.mxu0 %v4312_v41  ;;  %2400 = vmatprep.subr.bf16.mxu1 %v4312_v41 }
  0xf0   :  { %2150 = vmatpush1.bf16.msra.mxu0 %v2149_v18  ;;  %2402 = vmatpush1.bf16.msra.mxu1 %v2401_v45  ;;  %v4527_v18 = vld [vmem:[#allocation69_spill] sm:$0xff]  ;;  %v4528_v45 = vld [vmem:[#allocation72_spill] sm:$0xff] }
  0xf1   :  { %2151 = vmatprep.subr.bf16.mxu0 %v4312_v41  ;;  %2403 = vmatprep.subr.bf16.mxu1 %v4312_v41 }
  0xf4   :  { %2153 = vmatpush1.bf16.msra.mxu0 %v2152_v61  ;;  %2405 = vmatpush1.bf16.msra.mxu1 %v2404_v54  ;;  %v4529_v61 = vld [vmem:[#allocation73_spill] sm:$0xff]  ;;  %v4530_v54 = vld [vmem:[#allocation74_spill] sm:$0xff] }
  0xf5   :  { %2154 = vmatprep.subr.bf16.mxu0 %v4312_v41  ;;  %2406 = vmatprep.subr.bf16.mxu1 %v4312_v41 }
  0xf7   :  { %606 = vmatmul.mubr.f32.vlgmr.msra.gmra.mrb[0].mxu0 %v4500_v32  ;;  %1500 = vmatmul.mubr.f32.vlgmr.msra.gmra.mrb[0].mxu1 %v4500_v32  ;;  %v4531_v32 = vld [vmem:[#allocation75_spill] sm:$0xff] }
  0xf8   :  { %2156 = vmatpush1.bf16.msra.mxu0 %v4501_v47  ;;  %2408 = vmatpush1.bf16.msra.mxu1 %v4502_v5 }
  0xf9   :  { %2157 = vmatprep.subr.bf16.mxu0 %v4312_v41  ;;  %2409 = vmatprep.subr.bf16.mxu1 %v4312_v41 }
  0xfa   :  { %612 = vmatprep.mubr.f32.mxu0 %v4503_v1  ;;  %1506 = vmatprep.mubr.f32.mxu1 %v4503_v1  ;;  %v4532_v1 = vld [vmem:[#allocation71_spill] sm:$0xff] }
  0xfb   :  { %615 = vmatmul.mubr.f32.gmra.mrb[2].mxu0 %v4504_v27  ;;  %1509 = vmatmul.mubr.f32.gmra.mrb[2].mxu1 %v4504_v27  ;;  %v4533_v27 = vld [vmem:[#allocation70_spill] sm:$0xff] }
  0xfc   :  { %2159 = vmatpush1.bf16.msra.mxu0 %v4505_v52  ;;  %2411 = vmatpush1.bf16.msra.mxu1 %v4506_v13 }
  0xfd   :  { %2160 = vmatprep.subr.bf16.mxu0 %v4312_v41  ;;  %2412 = vmatprep.subr.bf16.mxu1 %v4312_v41 }
  0xfe   :  { %715 = vmatprep.mubr.f32.mxu0 %v4507_v50  ;;  %1609 = vmatprep.mubr.f32.mxu1 %v4507_v50  ;;  %v4534_v50 = vld [vmem:[#allocation27_spill] sm:$0xff] }
 0x100   :  { %2162 = vmatpush1.bf16.msra.mxu0 %v4508_v56  ;;  %2414 = vmatpush1.bf16.msra.mxu1 %v4509_v20 }
 0x101   :  { %2163 = vmatprep.subr.bf16.mxu0 %v4312_v41  ;;  %2415 = vmatprep.subr.bf16.mxu1 %v4312_v41 }
 0x104   :  { %2165 = vmatpush1.bf16.msra.mxu0 %v4510_v48  ;;  %2417 = vmatpush1.bf16.msra.mxu1 %v4511_v44 }
 0x105   :  { %2166 = vmatprep.subr.bf16.mxu0 %v4312_v41  ;;  %2418 = vmatprep.subr.bf16.mxu1 %v4312_v41 }
 0x108   :  { %2168 = vmatpush1.bf16.msra.mxu0 %v4512_v33  ;;  %2420 = vmatpush1.bf16.msra.mxu1 %v4513_v51 }
 0x109   :  { %2169 = vmatprep.subr.bf16.mxu0 %v4312_v41  ;;  %2421 = vmatprep.subr.bf16.mxu1 %v4312_v41 }
 0x10c   :  { %2171 = vmatpush1.bf16.msra.mxu0 %v4514_v43  ;;  %2423 = vmatpush1.bf16.msra.mxu1 %v4515_v31 }
 0x10d   :  { %2172 = vmatprep.subr.bf16.mxu0 %v4312_v41  ;;  %2424 = vmatprep.subr.bf16.mxu1 %v4312_v41 }
 0x110   :  { %2174 = vmatpush1.bf16.msra.mxu0 %v4516_v8  ;;  %2426 = vmatpush1.bf16.msra.mxu1 %v4517_v22 }
 0x111   :  { %2175 = vmatprep.subr.bf16.mxu0 %v4312_v41  ;;  %2427 = vmatprep.subr.bf16.mxu1 %v4312_v41 }
 0x114   :  { %2177 = vmatpush1.bf16.msra.mxu0 %v4518_v40  ;;  %2429 = vmatpush1.bf16.msra.mxu1 %v4519_v9 }
 0x115   :  { %2178 = vmatprep.subr.bf16.mxu0 %v4312_v41  ;;  %2430 = vmatprep.subr.bf16.mxu1 %v4312_v41 }
 0x118   :  { %2180 = vmatpush1.bf16.msra.mxu0 %v4520_v15  ;;  %2432 = vmatpush1.bf16.msra.mxu1 %v4521_v55 }
 0x119   :  { %2181 = vmatprep.subr.bf16.mxu0 %v4312_v41  ;;  %2433 = vmatprep.subr.bf16.mxu1 %v4312_v41 }
 0x11c   :  { %2183 = vmatpush1.bf16.msra.mxu0 %v4522_v34  ;;  %2435 = vmatpush1.bf16.msra.mxu1 %v4523_v0 }
 0x11d   :  { %2184 = vmatprep.subr.bf16.mxu0 %v4312_v41  ;;  %2436 = vmatprep.subr.bf16.mxu1 %v4312_v41 }
 0x120   :  { %2186 = vmatpush1.bf16.msra.mxu0 %v4524_v29  ;;  %2438 = vmatpush1.bf16.msra.mxu1 %v4525_v62 }
 0x121   :  { %2187 = vmatprep.subr.bf16.mxu0 %v4312_v41  ;;  %2439 = vmatprep.subr.bf16.mxu1 %v4312_v41 }
 0x124   :  { %2189 = vmatpush1.bf16.msra.mxu0 %v4526_v53  ;;  %2441 = vmatpush1.bf16.msra.mxu1 %v4527_v18 }
 0x125   :  { %2190 = vmatprep.subr.bf16.mxu0 %v4312_v41  ;;  %2442 = vmatprep.subr.bf16.mxu1 %v4312_v41 }
 0x128   :  { %2192 = vmatpush1.bf16.msra.mxu0 %v4528_v45  ;;  %2444 = vmatpush1.bf16.msra.mxu1 %v4529_v61  ;;  %v4535_v61 = vld [vmem:[#allocation54_spill] sm:$0xff] }
 0x129   :  { %2193 = vmatprep.subr.bf16.mxu0 %v4312_v41  ;;  %2445 = vmatprep.subr.bf16.mxu1 %v4312_v41 }
 0x12c   :  { %2195 = vmatpush1.bf16.msra.mxu0 %v4530_v54  ;;  %2447 = vmatpush1.bf16.msra.mxu1 %v4531_v32  ;;  %v4536_v32 = vld [vmem:[#allocation67_spill] sm:$0xff]  ;;  %v4537_v54 = vld [vmem:[#allocation29_spill] sm:$0xff] }
 0x12d   :  { %2196 = vmatprep.subr.bf16.mxu0 %v4312_v41  ;;  %2448 = vmatprep.subr.bf16.mxu1 %v4312_v41 }
 0x12f   :  { %719 = vmatmul.mubr.f32.vlgmr.msra.gmra.mrb[0].mxu0 %v4532_v1  ;;  %1613 = vmatmul.mubr.f32.vlgmr.msra.gmra.mrb[0].mxu1 %v4532_v1  ;;  %v4538_v1 = vld [vmem:[#allocation56_spill] sm:$0xff] }
 0x130   :  { %2198 = vmatpush1.bf16.msra.mxu0 %v4533_v27  ;;  %2450 = vmatpush1.bf16.msra.mxu1 %v4534_v50 }
 0x131   :  { %2199 = vmatprep.subr.bf16.mxu0 %v4312_v41  ;;  %2451 = vmatprep.subr.bf16.mxu1 %v4312_v41 }
 0x132   :  { %726 = vmatprep.mubr.f32.mxu0 %v4535_v61  ;;  %1620 = vmatprep.mubr.f32.mxu1 %v4535_v61 }
 0x133   :  { %730 = vmatmul.mubr.f32.gmra.mrb[2].mxu0 %v4536_v32  ;;  %1624 = vmatmul.mubr.f32.gmra.mrb[2].mxu1 %v4536_v32 }
 0x134   :  { %2201 = vmatpush1.bf16.msra.mxu0 %v4537_v54  ;;  %2453 = vmatpush1.bf16.msra.mxu1 %v3642_v14  ;;  %v4539_v14 = vand.u32 4294901760, %v4409_v35 }
 0x135   :  { %2202 = vmatprep.subr.bf16.mxu0 %v4312_v41  ;;  %2454 = vmatprep.subr.bf16.mxu1 %v4312_v41 }
 0x136   :  { %884 = vmatprep.mubr.f32.mxu0 %v4538_v1  ;;  %1778 = vmatprep.mubr.f32.mxu1 %v4538_v1 }
 0x138   :  { %2204 = vmatpush1.bf16.msra.mxu0 %v3650_v21  ;;  %2456 = vmatpush1.bf16.msra.mxu1 %v3656_v63  ;;  %v4540_v21 = vand.u32 4294901760, %v3239_v2  ;;  %v4545_v2 = vand.u32 4294901760, %v4498_v16 }
 0x139   :  { %2205 = vmatprep.subr.bf16.mxu0 %v4312_v41  ;;  %2457 = vmatprep.subr.bf16.mxu1 %v4312_v41 }
 0x13a   :  { %v2230_v63 = vpack.c.bf16 %v4540_v21, %v4539_v14 }
 0x13c   :  { %2207 = vmatpush1.bf16.msra.mxu0 %v3664_v30  ;;  %2459 = vmatpush1.bf16.msra.mxu1 %v3670_v10  ;;  %v4541_v30 = vand.u32 4294901760, %v4410_v39  ;;  %v4542_v10 = vand.u32 4294901760, %v3282_v19  ;;  %v4547_v19 = vld [vmem:[#allocation73_spill] sm:$0xff]  ;;  %v4548_v39 = vld [vmem:[#allocation74_spill] sm:$0xff] }
 0x13d   :  { %2208 = vmatprep.subr.bf16.mxu0 %v4312_v41  ;;  %2460 = vmatprep.subr.bf16.mxu1 %v4312_v41 }
 0x140   :  { %2210 = vmatpush1.bf16.msra.mxu0 %v3682_v46  ;;  %2462 = vmatpush1.bf16.msra.mxu1 %v3689_v26  ;;  %v2482_v46 = vpack.c.bf16 %v4542_v10, %v4541_v30  ;;  %v4543_v26 = vand.u32 4294901760, %v4496_v58 }
 0x141   :  { %2211 = vmatprep.subr.bf16.mxu0 %v4312_v41  ;;  %2463 = vmatprep.subr.bf16.mxu1 %v4312_v41 }
 0x144   :  { %2213 = vmatpush1.bf16.msra.mxu0 %v3703_v38  ;;  %2465 = vmatpush1.bf16.msra.mxu1 %v3711_v6  ;;  %v4544_v38 = vand.u32 4294901760, %v4497_v17  ;;  %v4546_v6 = vand.u32 4294901760, %v4499_v25 }
 0x145   :  { %2214 = vmatprep.subr.bf16.mxu0 %v4312_v41  ;;  %2466 = vmatprep.subr.bf16.mxu1 %v4312_v41 }
 0x146   :  { %v2233_v35 = vpack.c.bf16 %v4544_v38, %v4543_v26 }
 0x148   :  { %2216 = vmatpush1.bf16.msra.mxu0 %v3725_v28  ;;  %2468 = vmatpush1.bf16.msra.mxu1 %v3732_v11  ;;  %v2485_v28 = vpack.c.bf16 %v4546_v6, %v4545_v2  ;;  %v4549_v11 = vld [vmem:[#allocation75_spill] sm:$0xff] }
 0x149   :  { %2217 = vmatprep.subr.bf16.mxu0 %v4312_v41  ;;  %2469 = vmatprep.subr.bf16.mxu1 %v4312_v41 }
 0x14c   :  { %2219 = vmatpush1.bf16.msra.mxu0 %v3744_v57  ;;  %2471 = vmatpush1.bf16.msra.mxu1 %v3750_v42  ;;  %v2718_v57 = vmov 0.0  }
 0x14d   :  { %2220 = vmatprep.subr.bf16.mxu0 %v4312_v41  ;;  %2472 = vmatprep.subr.bf16.mxu1 %v4312_v41  ;;  %78 = vst.msk [vmem:[#allocation10] sm:$0x1f] %vm77_vm2, %v2718_v57 }
 0x150   :  { %2222 = vmatpush1.bf16.msra.mxu0 %v3762_v59  ;;  %2474 = vmatpush1.bf16.msra.mxu1 %v3768_v12  ;;  %v84_v59 = vld [vmem:[#allocation5 + $0x8] sm:$0xff] }
 0x151   :  { %2223 = vmatprep.subr.bf16.mxu0 %v4312_v41  ;;  %2475 = vmatprep.subr.bf16.mxu1 %v4312_v41 }
 0x154   :  { %2225 = vmatpush1.bf16.msra.mxu0 %v3780_v23  ;;  %2477 = vmatpush1.bf16.msra.mxu1 %v3786_v4 }
 0x155   :  { %2226 = vmatprep.subr.bf16.mxu0 %v4312_v41  ;;  %2478 = vmatprep.subr.bf16.mxu1 %v4312_v41 }
 0x158   :  { %2228 = vmatpush1.bf16.msra.mxu0 %v3798_v24  ;;  %2480 = vmatpush1.bf16.msra.mxu1 %v3804_v7 }
 0x159   :  { %2229 = vmatprep.subr.bf16.mxu0 %v4312_v41  ;;  %2481 = vmatprep.subr.bf16.mxu1 %v4312_v41 }
 0x15c   :  { %2231 = vmatpush1.bf16.msra.mxu0 %v2230_v63  ;;  %2483 = vmatpush1.bf16.msra.mxu1 %v2482_v46 }
 0x15d   :  { %2232 = vmatprep.subr.bf16.mxu0 %v4312_v41  ;;  %2484 = vmatprep.subr.bf16.mxu1 %v4312_v41 }
 0x160   :  { %2234 = vmatpush1.bf16.msra.mxu0 %v2233_v35  ;;  %2486 = vmatpush1.bf16.msra.mxu1 %v2485_v28 }
 0x161   :  { %2235 = vmatprep.subr.bf16.mxu0 %v4312_v41  ;;  %2487 = vmatprep.subr.bf16.mxu1 %v4312_v41 }
 0x164   :  { %2237 = vmatpush1.bf16.msra.mxu0 %v3828_v60  ;;  %2489 = vmatpush1.bf16.msra.mxu1 %v3834_v49 }
 0x165   :  { %2238 = vmatprep.subr.bf16.mxu0 %v4312_v41  ;;  %2490 = vmatprep.subr.bf16.mxu1 %v4312_v41 }
 0x167   :  { %886 = vmatmul.mubr.f32.vlgmr.msra.gmra.mrb[0].mxu0 %v4452_v36  ;;  %1780 = vmatmul.mubr.f32.vlgmr.msra.gmra.mrb[0].mxu1 %v4452_v36 }
 0x168   :  { %2240 = vmatpush1.bf16.msra.mxu0 %v4501_v47  ;;  %2492 = vmatpush1.bf16.msra.mxu1 %v4502_v5 }
 0x169   :  { %2241 = vmatprep.subr.bf16.mxu0 %v4312_v41  ;;  %2493 = vmatprep.subr.bf16.mxu1 %v4312_v41 }
 0x16a   :  { %891 = vmatprep.mubr.f32.mxu0 %v3490_v37  ;;  %1785 = vmatprep.mubr.f32.mxu1 %v3490_v37 }
 0x16b   :  { %893 = vmatmul.mubr.f32.gmra.mrb[2].mxu0 %v3517_v3  ;;  %1787 = vmatmul.mubr.f32.gmra.mrb[2].mxu1 %v3517_v3 }
 0x16c   :  { %2243 = vmatpush1.bf16.msra.mxu0 %v4505_v52  ;;  %2495 = vmatpush1.bf16.msra.mxu1 %v4506_v13 }
 0x16d   :  { %2244 = vmatprep.subr.bf16.mxu0 %v4312_v41  ;;  %2496 = vmatprep.subr.bf16.mxu1 %v4312_v41 }
 0x16e   :  { %991 = vmatprep.mubr.f32.mxu0 %v4538_v1  ;;  %1885 = vmatprep.mubr.f32.mxu1 %v4538_v1 }
 0x170   :  { %2246 = vmatpush1.bf16.msra.mxu0 %v4508_v56  ;;  %2498 = vmatpush1.bf16.msra.mxu1 %v4509_v20 }
 0x171   :  { %2247 = vmatprep.subr.bf16.mxu0 %v4312_v41  ;;  %2499 = vmatprep.subr.bf16.mxu1 %v4312_v41 }
 0x174   :  { %2249 = vmatpush1.bf16.msra.mxu0 %v4510_v48  ;;  %2501 = vmatpush1.bf16.msra.mxu1 %v4511_v44 }
 0x175   :  { %2250 = vmatprep.subr.bf16.mxu0 %v4312_v41  ;;  %2502 = vmatprep.subr.bf16.mxu1 %v4312_v41 }
 0x178   :  { %2252 = vmatpush1.bf16.msra.mxu0 %v4512_v33  ;;  %2504 = vmatpush1.bf16.msra.mxu1 %v4513_v51 }
 0x179   :  { %2253 = vmatprep.subr.bf16.mxu0 %v4312_v41  ;;  %2505 = vmatprep.subr.bf16.mxu1 %v4312_v41 }
 0x17c   :  { %2255 = vmatpush1.bf16.msra.mxu0 %v4514_v43  ;;  %2507 = vmatpush1.bf16.msra.mxu1 %v4515_v31 }
 0x17d   :  { %2256 = vmatprep.subr.bf16.mxu0 %v4312_v41  ;;  %2508 = vmatprep.subr.bf16.mxu1 %v4312_v41 }
 0x180   :  { %2258 = vmatpush1.bf16.msra.mxu0 %v4516_v8  ;;  %2510 = vmatpush1.bf16.msra.mxu1 %v4517_v22 }
 0x181   :  { %2259 = vmatprep.subr.bf16.mxu0 %v4312_v41  ;;  %2511 = vmatprep.subr.bf16.mxu1 %v4312_v41 }
 0x184   :  { %2261 = vmatpush1.bf16.msra.mxu0 %v4518_v40  ;;  %2513 = vmatpush1.bf16.msra.mxu1 %v4519_v9 }
 0x185   :  { %2262 = vmatprep.subr.bf16.mxu0 %v4312_v41  ;;  %2514 = vmatprep.subr.bf16.mxu1 %v4312_v41 }
 0x188   :  { %2264 = vmatpush1.bf16.msra.mxu0 %v4520_v15  ;;  %2516 = vmatpush1.bf16.msra.mxu1 %v4521_v55 }
 0x189   :  { %2265 = vmatprep.subr.bf16.mxu0 %v4312_v41  ;;  %2517 = vmatprep.subr.bf16.mxu1 %v4312_v41 }
 0x18c   :  { %2267 = vmatpush1.bf16.msra.mxu0 %v4522_v34  ;;  %2519 = vmatpush1.bf16.msra.mxu1 %v4523_v0 }
 0x18d   :  { %2268 = vmatprep.subr.bf16.mxu0 %v4312_v41  ;;  %2520 = vmatprep.subr.bf16.mxu1 %v4312_v41 }
 0x190   :  { %2270 = vmatpush1.bf16.msra.mxu0 %v4524_v29  ;;  %2522 = vmatpush1.bf16.msra.mxu1 %v4525_v62 }
 0x191   :  { %2271 = vmatprep.subr.bf16.mxu0 %v4312_v41  ;;  %2523 = vmatprep.subr.bf16.mxu1 %v4312_v41 }
 0x194   :  { %2273 = vmatpush1.bf16.msra.mxu0 %v4526_v53  ;;  %2525 = vmatpush1.bf16.msra.mxu1 %v4527_v18 }
 0x195   :  { %2274 = vmatprep.subr.bf16.mxu0 %v4312_v41  ;;  %2526 = vmatprep.subr.bf16.mxu1 %v4312_v41 }
 0x198   :  { %2276 = vmatpush1.bf16.msra.mxu0 %v4528_v45  ;;  %2528 = vmatpush1.bf16.msra.mxu1 %v4547_v19 }
 0x199   :  { %2277 = vmatprep.subr.bf16.mxu0 %v4312_v41  ;;  %2529 = vmatprep.subr.bf16.mxu1 %v4312_v41  ;;  %v83_v41 = vld [vmem:[#allocation5] sm:$0xff] }
 0x19a   :  { %vm1899_vm3 = vcmp.gt.f32.partialorder %v83_v41, -20.0 }
 0x19b   :  { %v2026_v7 = vsel %vm1899_vm3, 1.0, %v2718_v57 }
 0x19c   :  { %2279 = vmatpush1.bf16.msra.mxu0 %v4548_v39  ;;  %2531 = vmatpush1.bf16.msra.mxu1 %v4549_v11  ;;  %v1968_v45 = vsel %vm1943_vm5, %v2026_v7, 0.0  ;;  %v1953_v26 = vsub.f32 1.0, %v2026_v7 }
 0x19f   :  { %993 = vmatmul.mubr.f32.vlgmr.msra.gmra.mrb[0].mxu0 %v4452_v36  ;;  %1887 = vmatmul.mubr.f32.vlgmr.msra.gmra.mrb[0].mxu1 %v4452_v36 }
 0x1a0   :  { %998 = vmatprep.mubr.f32.mxu0 %v3490_v37  ;;  %1892 = vmatprep.mubr.f32.mxu1 %v3490_v37 }
 0x1a3   :  { %1000 = vmatmul.mubr.f32.gmra.mrb[2].mxu0 %v3517_v3  ;;  %1894 = vmatmul.mubr.f32.gmra.mrb[2].mxu1 %v3517_v3  ;;  %v103_v3 = vsel %vm93_vm1, %v84_v59, -16384.0 }
 0x1a4   :  { %vm1900_vm4 = vcmp.gt.f32.partialorder %v103_v3, -20.0 }
 0x1a5   :  { %v2027_v20 = vsel %vm1900_vm4, 1.0, %v2718_v57 }
 0x1a6   :  { %v1969_v61 = vsel %vm1943_vm5, %v2027_v20, 0.0 }
 0x1a7   :  { %v1970_v1 = vadd.f32 %v1969_v61, %v1968_v45 }
 0x1a9   :  { %v1971_v2 = vrot.slane %v1970_v1, 4 }
 0x272   :  { %v4071_v42 = vpop.f32.mrb[0].mxu0  ;;  %v1888_v36 = vpop.f32.mrb[0].mxu1 }
 0x273   :  { %v1909_v12 = vand.u32 2147483647, %v4071_v42  ;;  %v996_v23 = vpop.f32.mrb[1].mxu0  ;;  %v1937_v4 = vsub.f32 %v1888_v36, %v83_v41  ;;  %v1890_v24 = vpop.f32.mrb[1].mxu1  ;;  %v1905_v53 = vsub.f32 0.0, %v4071_v42  ;;  %v1954_v41 = vsub.f32 1.0, %v2027_v20 }
 0x274   :  { %v1972_v23 = vadd.f32 %v1971_v2, %v1970_v1 }
 0x275   :  { %v1911_v37 = vsub.f32 0.0, %v1909_v12  ;;  %v1939_v49 = vmul.f32 %v1937_v4, %v1937_v4  ;;  %v1907_v14 = vmax.f32 %v1905_v53, 0.0 }
 0x276   :  { %v1001_v58 = vpop.f32.mrb[2].mxu0  ;;  %v1895_v25 = vpop.f32.mrb[2].mxu1 }
 0x277   :  { %v1913_v17 = vmul.f32 1.442695, %v1911_v37  ;;  %v1910_v16 = vand.u32 2147483647, %v1001_v58  ;;  %v1977_v47 = vmul.f32 %v2026_v7, %v1939_v49  ;;  %v1938_v5 = vsub.f32 %v1895_v25, %v103_v3  ;;  %v1003_v52 = vpop.f32.mrb[3].mxu0  ;;  %v1897_v13 = vpop.f32.mrb[3].mxu1 }
 0x278   :  { %v1988_v33 = vsel %vm1943_vm5, %v1939_v49, 0.0  ;;  %v1906_v21 = vsub.f32 0.0, %v1001_v58 }
 0x279   :  { %2583 = vpow2.f32 %v1913_v17  ;;  %v1912_v56 = vsub.f32 0.0, %v1910_v16  ;;  %v1940_v48 = vmul.f32 %v1938_v5, %v1938_v5  ;;  %v1979_v8 = vsel %vm1943_vm5, %v1977_v47, 0.0 }
 0x27a   :  { %v1908_v19 = vmax.f32 %v1906_v21, 0.0  ;;  %v1973_v17 = vrot.slane %v1972_v23, 2 }
 0x27b   :  { %v1915_v44 = vmul.f32 1.442695, %v1912_v56  ;;  %v1978_v51 = vmul.f32 %v2027_v20, %v1940_v48  ;;  %v1989_v43 = vsel %vm1943_vm5, %v1940_v48, 0.0 }
 0x27c   :  { %v1990_v31 = vadd.f32 %v1989_v43, %v1988_v33  ;;  %v1974_v13 = vadd.f32 %v1973_v17, %v1972_v23 }
 0x27d   :  { %2585 = vpow2.f32 %v1915_v44  ;;  %v1980_v22 = vsel %vm1943_vm5, %v1978_v51, 0.0 }
 0x27e   :  { %v1981_v40 = vadd.f32 %v1980_v22, %v1979_v8  ;;  %v1991_v4 = vrot.slane %v1990_v31, 4  ;;  %v1975_v43 = vrot.slane %v1974_v13, 1 }
 0x280   :  { %v1982_v59 = vrot.slane %v1981_v40, 4  ;;  %v1992_v16 = vadd.f32 %v1991_v4, %v1990_v31 }
 0x282   :  { %v1983_v49 = vadd.f32 %v1982_v59, %v1981_v40  ;;  %v1993_v56 = vrot.slane %v1992_v16, 2 }
 0x283   :  { %v2584_v9 = vpop.eup %2583 }
 0x284   :  { %v1917_v15 = vadd.f32 1.0, %v2584_v9  ;;  %v1920_v0 = vmul.f32 -0.5, %v2584_v9  ;;  %v1923_v18 = vand.u32 2147483647, %v2584_v9  ;;  %v1984_v52 = vrot.slane %v1983_v49, 2 }
 0x285   :  { %v1994_v8 = vadd.f32 %v1993_v56, %v1992_v16 }
 0x286   :  { %2587 = vlog2.f32 %v1917_v15  ;;  %v1921_v29 = vadd.f32 1.0, %v1920_v0  ;;  %vm1924_vm6 = vcmp.lt.f32.partialorder %v1923_v18, 0.0004427343  ;;  %v1985_v51 = vadd.f32 %v1984_v52, %v1983_v49  ;;  %v1997_v18 = vld [vmem:[#allocation10] sm:$0x1f] }
 0x287   :  { %v2586_v55 = vpop.eup %2585  ;;  %v1995_v31 = vrot.slane %v1994_v8, 1 }
 0x288   :  { %v1926_v34 = vadd.f32 1.0, %v2586_v55  ;;  %v1929_v62 = vmul.f32 -0.5, %v2586_v55  ;;  %v1922_v27 = vmul.f32 %v2584_v9, %v1921_v29  ;;  %v1932_v63 = vand.u32 2147483647, %v2586_v55 }
 0x289   :  { %v1986_v15 = vrot.slane %v1985_v51, 1  ;;  %v1996_v53 = vadd.f32 %v1995_v31, %v1994_v8 }
 0x28a   :  { %2589 = vlog2.f32 %v1926_v34  ;;  %v1930_v50 = vadd.f32 1.0, %v1929_v62  ;;  %vm1933_vm7 = vcmp.lt.f32.partialorder %v1932_v63, 0.0004427343 }
 0x28b   :  { %v1987_v29 = vadd.f32 %v1986_v15, %v1985_v51 }
 0x28c   :  { %v1931_v35 = vmul.f32 %v2586_v55, %v1930_v50  ;;  %v1976_v55 = vadd.f32 %v1975_v43, %v1974_v13 }
 0x290   :  { %v2588_v54 = vpop.eup %2587 }
 0x291   :  { %v1919_v32 = vmul.f32 0.6931472, %v2588_v54 }
 0x293   :  { %v1925_v30 = vsel %vm1924_vm6, %v1922_v27, %v1919_v32 }
 0x294   :  { %v2590_v10 = vpop.eup %2589  ;;  %v1935_v46 = vadd.f32 %v1925_v30, %v1907_v14 }
 0x295   :  { %v1928_v38 = vmul.f32 0.6931472, %v2590_v10 }
 0x296   :  { %v1955_v6 = vadd.f32 %v1935_v46, %v4071_v42  ;;  %v1941_v28 = vmul.f32 %v2026_v7, %v1935_v46 }
 0x297   :  { %v1934_v39 = vsel %vm1933_vm7, %v1931_v35, %v1928_v38 }
 0x298   :  { %v1957_v11 = vmul.f32 %v1955_v6, %v1953_v26  ;;  %v1936_v57 = vadd.f32 %v1934_v39, %v1908_v19  ;;  %v1944_v24 = vsel %vm1943_vm5, %v1941_v28, 0.0 }
 0x29a   :  { %v1956_v12 = vadd.f32 %v1936_v57, %v1001_v58  ;;  %v1942_v36 = vmul.f32 %v2027_v20, %v1936_v57  ;;  %v1959_v42 = vsel %vm1943_vm5, %v1957_v11, 0.0 }
 0x29c   :  { %v1945_v37 = vsel %vm1943_vm5, %v1942_v36, 0.0  ;;  %v1958_v60 = vmul.f32 %v1956_v12, %v1954_v41 }
 0x29d   :  { %v1946_v3 = vadd.f32 %v1945_v37, %v1944_v24 }
 0x29e   :  { %v1960_v7 = vsel %vm1943_vm5, %v1958_v60, 0.0 }
 0x29f   :  { %v1947_v25 = vrot.slane %v1946_v3, 4  ;;  %v1961_v47 = vadd.f32 %v1960_v7, %v1959_v42 }
 0x2a1   :  { %v1948_v5 = vadd.f32 %v1947_v25, %v1946_v3  ;;  %v1962_v58 = vrot.slane %v1961_v47, 4 }
 0x2a3   :  { %v1949_v20 = vrot.slane %v1948_v5, 2  ;;  %v1963_v48 = vadd.f32 %v1962_v58, %v1961_v47 }
 0x2a5   :  { %v1950_v44 = vadd.f32 %v1949_v20, %v1948_v5  ;;  %v1964_v33 = vrot.slane %v1963_v48, 2 }
 0x2a7   :  { %v1951_v22 = vrot.slane %v1950_v44, 1  ;;  %v1965_v40 = vadd.f32 %v1964_v33, %v1963_v48 }
 0x2a9   :  { %v1966_v9 = vrot.slane %v1965_v40, 1  ;;  %v1952_v34 = vadd.f32 %v1951_v22, %v1950_v44 }
 0x2ab   :  { %v1967_v0 = vadd.f32 %v1966_v9, %v1965_v40 }
 0x2ad   :  { %v1999_v62 = vsel %vm1998_vm8, %v1952_v34, %v1967_v0 }
 0x2ae   :  { %v2001_v45 = vsel %vm2000_vm9, %v1999_v62, %v1976_v55 }
 0x2af   :  { %v2003_v61 = vsel %vm2002_vm10, %v2001_v45, %v1987_v29 }
 0x2b0   :  { %v2005_v54 = vsel %vm2004_vm11, %v2003_v61, %v1996_v53 }
 0x2b1   :  { %v2006_v32 = vadd.f32 %v2005_v54, %v1997_v18 }
 0x2b3   :  { %2008 = vst.msk [vmem:[#allocation10] sm:$0x1f] %vm77_vm2, %v2006_v32 }
 0x2b4   :  { %2690 = shalt.err (!%p2687_p8)
}
 0x2b5   :  { %s2691_s15 = scalar_lea.hbm %s4105_s4, 128 }
 0x2b6   :  { %p2692_p9 = scmp.ne.s32.totalorder %s4105_s4, %s2691_s15  ;;  %p2695_p10 = scmp.lt.u32.totalorder %s2691_s15, %s4105_s4 }
 0x2b8   :  { %p2697_p11 = pnand %p2695_p10, %p2692_p9 }
 0x2ba   :  { %2700 = shalt.err (!%p2697_p11)
}
 0x2bb   :  { %2018 = dma.vmem_to_hbm [thread:$0]  %s2016_s25, 128, %s4105_s4, [#allocation4]  }
 0x2bc   :  { %2707 = dma.done.wait [#allocation4], 128  }
 0x2bd   :  { %2708 = vsyncadd [#allocation4], 4294967168 }
 0x2be   :  { %2022 = vsyncpa [#allocation3], 1 }
 0x2bf   :  { %2023 = vsyncpa [#allocation6], 1 }
 0x2c0   :  { %2024 = vsyncpa [#allocation9], 1 }
 0x2c1   :  { %2025 = vsyncpa [#allocation4], 1 }

</bundles_post_ra>
